<compile_context>
chip_gen: v5e
topology: v5e:2x2
jax: 0.10.0
libtpu: 0.0.40
codegen_flags: <defaults>
</compile_context>

<pallas_src>
import jax
import jax.numpy as jnp
from jax.experimental import pallas as pl
from jax.experimental.pallas import tpu as pltpu

# --- Problem sizes (synthetic, consistent with the module) -------------------
NUM_STATES = 3            # e.g. Pendulum-v1 observation dim
ACTION_DIM = 1            # e.g. Pendulum-v1 action dim
IN_DIM = NUM_STATES + ACTION_DIM
H1, H2, OUT = 400, 300, 1

# Lane-aligned (multiple-of-128) padded sizes used inside the kernel.
H1P, H2P, OUTP = 512, 384, 128

BATCH = 256               # DDPG replay minibatch; amortizes fixed overhead
BM = 128                  # batch rows per grid step


def critic_kernel(x_ref, slab_ref, w2_ref, w3_ref, out_ref):
    """One 128-row batch block of the full 3-layer MLP, entirely in VMEM."""
    x = x_ref[...]                                   # (BM, IN_DIM)

    slab = slab_ref[...]                             # (8, H1P) packed w1+biases
    w1 = slab[0:IN_DIM, :]                           # (IN_DIM, H1P)
    b1 = slab[IN_DIM:IN_DIM + 1, :]                  # (1, H1P)
    b2 = slab[IN_DIM + 1:IN_DIM + 2, 0:H2P]          # (1, H2P)
    b3 = slab[IN_DIM + 2:IN_DIM + 3, 0:OUTP]         # (1, OUTP)

    h1 = jnp.dot(x, w1, preferred_element_type=jnp.float32)
    h1 = jnp.maximum(h1 + b1, 0.0)                   # ReLU(fc1)  (BM, H1P)

    h2 = jnp.dot(h1, w2_ref[...], preferred_element_type=jnp.float32)
    h2 = jnp.maximum(h2 + b2, 0.0)                   # ReLU(fc2)  (BM, H2P)

    q = jnp.dot(h2, w3_ref[...], preferred_element_type=jnp.float32)
    out_ref[...] = (q + b3).astype(out_ref.dtype)    # fc3, lane-dense (BM, OUTP)


def pack_params(params):
    """Zero-pad to lane multiples and pack (w1, b1, b2, b3) into one slab."""
    w1, b1, w2, b2, w3, b3 = params
    slab1 = jnp.zeros((8, H1P), jnp.float32)
    slab1 = slab1.at[0:IN_DIM, 0:H1].set(w1)
    slab1 = slab1.at[IN_DIM, 0:H1].set(b1)
    slab1 = slab1.at[IN_DIM + 1, 0:H2].set(b2)
    slab1 = slab1.at[IN_DIM + 2, 0:OUT].set(b3)
    w2p = jnp.zeros((H1P, H2P), jnp.float32).at[0:H1, 0:H2].set(w2)
    w3p = jnp.zeros((H2P, OUTP), jnp.float32).at[0:H2, 0:OUT].set(w3)
    return slab1, w2p, w3p


def critic_forward(x, packed):
    """x: (batch, IN_DIM) state-action concat -> (batch, 1) Q-values."""
    slab1, w2p, w3p = packed
    b = x.shape[0]
    bp = ((b + BM - 1) // BM) * BM
    if bp != b:                                      # pad batch to block size
        x = jnp.pad(x, ((0, bp - b), (0, 0)))
    grid = (bp // BM,)

    out = pl.pallas_call(
        critic_kernel,
        out_shape=jax.ShapeDtypeStruct((bp, OUTP), jnp.float32),
        grid=grid,
        in_specs=[
            pl.BlockSpec((BM, IN_DIM), lambda i: (i, 0)),   # batch-blocked x
            pl.BlockSpec((8, H1P), lambda i: (0, 0)),       # resident w1+biases
            pl.BlockSpec((H1P, H2P), lambda i: (0, 0)),     # resident w2
            pl.BlockSpec((H2P, OUTP), lambda i: (0, 0)),    # resident w3
        ],
        out_specs=pl.BlockSpec((BM, OUTP), lambda i: (i, 0)),
        compiler_params=pltpu.CompilerParams(
            dimension_semantics=("parallel",)),             # v7x: 2 TCs share batch
    )(x, slab1, w2p, w3p)

    return out[:b, :OUT]                              # slice the single Q column


def init_params(key):
    """PyTorch-style Linear init: U(-1/sqrt(fan_in), 1/sqrt(fan_in))."""
    def linear(key, fan_in, fan_out):
        kw, kb = jax.random.split(key)
        bound = 1.0 / jnp.sqrt(fan_in)
        w = jax.random.uniform(kw, (fan_in, fan_out), jnp.float32, -bound, bound)
        b = jax.random.uniform(kb, (fan_out,), jnp.float32, -bound, bound)
        return w, b

    k1, k2, k3 = jax.random.split(key, 3)
    w1, b1 = linear(k1, IN_DIM, H1)
    w2, b2 = linear(k2, H1, H2)
    w3, b3 = linear(k3, H2, OUT)
    return w1, b1, w2, b2, w3, b3


def critic_reference(x, params):
    """Plain-JAX reference (unpadded) for correctness checking."""
    w1, b1, w2, b2, w3, b3 = params
    h1 = jnp.maximum(x @ w1 + b1, 0.0)
    h2 = jnp.maximum(h1 @ w2 + b2, 0.0)
    return h2 @ w3 + b3


if __name__ == "__main__":
    key = jax.random.PRNGKey(0)
    kp, kx = jax.random.split(key)
    params = init_params(kp)
    packed = pack_params(params)

    # state-action input, as in DDPG critic: concat([state, action], -1)
    x = jax.random.normal(kx, (BATCH, IN_DIM), jnp.float32)

    out = jax.jit(critic_forward)(x, packed)
    out = jax.block_until_ready(out)

    ref = critic_reference(x, params)
    assert out.shape == (BATCH, OUT)
    assert jnp.allclose(out, ref, atol=1e-4, rtol=1e-4)

    print("KERNEL_OK")
</pallas_src>

<mosaic_0001>
module attributes {stable_mosaic.version = 11 : i64} {
  func.func @critic_kernel(%arg0: i32, %arg1: memref<128x4xf32, #tpu.memory_space<vmem>>, %arg2: memref<8x512xf32, #tpu.memory_space<vmem>>, %arg3: memref<512x384xf32, #tpu.memory_space<vmem>>, %arg4: memref<384x128xf32, #tpu.memory_space<vmem>>, %arg5: memref<128x128xf32, #tpu.memory_space<vmem>>) attributes {dimension_semantics = [#tpu.dimension_semantics<parallel>], iteration_bounds = array<i64: 2>, scalar_prefetch = 0 : i64, scratch_operands = 0 : i64, tpu.core_type = #tpu.core_type<tc>, window_params = [{transform_indices = @transform_0, window_bounds = array<i64: 128, 4>}, {pipeline_mode = #tpu.pipeline_mode<synchronous>, transform_indices = @transform_1, window_bounds = array<i64: 8, 512>}, {pipeline_mode = #tpu.pipeline_mode<synchronous>, transform_indices = @transform_2, window_bounds = array<i64: 512, 384>}, {pipeline_mode = #tpu.pipeline_mode<synchronous>, transform_indices = @transform_3, window_bounds = array<i64: 384, 128>}, {transform_indices = @transform_4, window_bounds = array<i64: 128, 128>}]} {
    %c0 = arith.constant 0 : index
    %c0_0 = arith.constant 0 : index
    %0 = vector.load %arg1[%c0, %c0_0] : memref<128x4xf32, #tpu.memory_space<vmem>>, vector<128x4xf32>
    %c0_1 = arith.constant 0 : index
    %c0_2 = arith.constant 0 : index
    %1 = vector.load %arg2[%c0_1, %c0_2] : memref<8x512xf32, #tpu.memory_space<vmem>>, vector<8x512xf32>
    %2 = vector.extract_strided_slice %1 {offsets = [0, 0], sizes = [4, 512], strides = [1, 1]} : vector<8x512xf32> to vector<4x512xf32>
    %3 = vector.extract_strided_slice %1 {offsets = [4, 0], sizes = [1, 512], strides = [1, 1]} : vector<8x512xf32> to vector<1x512xf32>
    %4 = vector.extract_strided_slice %1 {offsets = [5, 0], sizes = [1, 384], strides = [1, 1]} : vector<8x512xf32> to vector<1x384xf32>
    %5 = vector.extract_strided_slice %1 {offsets = [6, 0], sizes = [1, 128], strides = [1, 1]} : vector<8x512xf32> to vector<1x128xf32>
    %cst = arith.constant dense<0.000000e+00> : vector<128x512xf32>
    %6 = tpu.matmul %0, %2, %cst {dimension_numbers = #tpu.dot_dimension_numbers<[1], [0], [0], [1], [0, 0, 1, 1], [], []>} : vector<128x4xf32>, vector<4x512xf32>, vector<128x512xf32> -> vector<128x512xf32>
    %7 = vector.broadcast %3 : vector<1x512xf32> to vector<128x512xf32>
    %8 = arith.addf %6, %7 : vector<128x512xf32>
    %cst_3 = arith.constant 0.000000e+00 : f32
    %9 = vector.broadcast %cst_3 : f32 to vector<128x512xf32>
    %10 = arith.maximumf %8, %9 : vector<128x512xf32>
    %c0_4 = arith.constant 0 : index
    %c0_5 = arith.constant 0 : index
    %11 = vector.load %arg3[%c0_4, %c0_5] : memref<512x384xf32, #tpu.memory_space<vmem>>, vector<512x384xf32>
    %cst_6 = arith.constant dense<0.000000e+00> : vector<128x384xf32>
    %12 = tpu.matmul %10, %11, %cst_6 {dimension_numbers = #tpu.dot_dimension_numbers<[1], [0], [0], [1], [0, 0, 1, 1], [], []>} : vector<128x512xf32>, vector<512x384xf32>, vector<128x384xf32> -> vector<128x384xf32>
    %13 = vector.broadcast %4 : vector<1x384xf32> to vector<128x384xf32>
    %14 = arith.addf %12, %13 : vector<128x384xf32>
    %cst_7 = arith.constant 0.000000e+00 : f32
    %15 = vector.broadcast %cst_7 : f32 to vector<128x384xf32>
    %16 = arith.maximumf %14, %15 : vector<128x384xf32>
    %c0_8 = arith.constant 0 : index
    %c0_9 = arith.constant 0 : index
    %17 = vector.load %arg4[%c0_8, %c0_9] : memref<384x128xf32, #tpu.memory_space<vmem>>, vector<384x128xf32>
    %cst_10 = arith.constant dense<0.000000e+00> : vector<128x128xf32>
    %18 = tpu.matmul %16, %17, %cst_10 {dimension_numbers = #tpu.dot_dimension_numbers<[1], [0], [0], [1], [0, 0, 1, 1], [], []>} : vector<128x384xf32>, vector<384x128xf32>, vector<128x128xf32> -> vector<128x128xf32>
    %19 = vector.broadcast %5 : vector<1x128xf32> to vector<128x128xf32>
    %20 = arith.addf %18, %19 : vector<128x128xf32>
    %c0_11 = arith.constant 0 : index
    %c0_12 = arith.constant 0 : index
    %21 = vector.load %arg5[%c0_11, %c0_12] : memref<128x128xf32, #tpu.memory_space<vmem>>, vector<128x128xf32>
    tpu.vector_store %arg5[%c0_11, %c0_12], %20 {strides = array<i32>} : memref<128x128xf32, #tpu.memory_space<vmem>>, vector<128x128xf32>,
    return
  }
  func.func @transform_0(%arg0: i32) -> (i32, i32) {
    %c0_i32 = arith.constant 0 : i32
    %c0_i32_0 = arith.constant 0 : i32
    return %arg0, %c0_i32 : i32, i32
  }
  func.func @transform_1(%arg0: i32) -> (i32, i32) {
    %c0_i32 = arith.constant 0 : i32
    %c0_i32_0 = arith.constant 0 : i32
    %c0_i32_1 = arith.constant 0 : i32
    return %c0_i32, %c0_i32_0 : i32, i32
  }
  func.func @transform_2(%arg0: i32) -> (i32, i32) {
    %c0_i32 = arith.constant 0 : i32
    %c0_i32_0 = arith.constant 0 : i32
    %c0_i32_1 = arith.constant 0 : i32
    return %c0_i32, %c0_i32_0 : i32, i32
  }
  func.func @transform_3(%arg0: i32) -> (i32, i32) {
    %c0_i32 = arith.constant 0 : i32
    %c0_i32_0 = arith.constant 0 : i32
    %c0_i32_1 = arith.constant 0 : i32
    return %c0_i32, %c0_i32_0 : i32, i32
  }
  func.func @transform_4(%arg0: i32) -> (i32, i32) {
    %c0_i32 = arith.constant 0 : i32
    %c0_i32_0 = arith.constant 0 : i32
    return %arg0, %c0_i32 : i32, i32
  }
}

</mosaic_0001>

<bundles_post_ra>
// kernel: critic_forward.1
= control target key start
LH: loop header
LB: loop body
LE: loop exit
PB: predicated region body
PF: predicated region fallthrough
CT: control target
= control target key end

     0   :  { %9 = vsyncpa [#allocation3], 0  ;;  %s3457_s0 = inlined_call_operand.vmem [shape: f32[256,4], index: 0, kind: input, shape index: {}]   ;;  %s3458_s1 = inlined_call_operand.vmem [shape: f32[8,512], index: 1, kind: input, shape index: {}]   ;;  %s3459_s2 = inlined_call_operand.hbm [shape: f32[512,384], index: 2, kind: input, shape index: {}]   ;;  %s3460_s3 = inlined_call_operand.hbm [shape: f32[384,128], index: 3, kind: input, shape index: {}]   ;;  %s3461_s4 = inlined_call_operand.vmem [shape: f32[256,128], index: 4, kind: output, shape index: {}]  }
   0x1   :  { %10 = vsyncpa [#allocation5], 0  ;;  %s2236_s15 = smov 0  }
   0x2 LB: > { %s150_s18 = sshll.u32 %s3459_s2, 4  ;;  %s2006_s19 = sadd.s32 4294967295, %s2203_s15   ;;  %s2203_s15 = sphi %s2236_s15, %s16_s15   ;;  %s151_s18 = int_to_ptr.hbm [resolvable:$true] %s150_s18 }
   0x3   : > { %p2008_p0 = scmp.ge.s32.totalorder %s2203_s15, 1  ;;  %p136_p1 = scmp.lt.s32.totalorder %s2203_s15, 3 }
   0x4   : > { %p2247_p2 = scmp.eq.s32.totalorder %s2006_s19, 0  ;;  %s2205_s22 = smov [#allocation2]  }
   0x5   : > { %p2251_p3 = pnand %p2008_p0, %p136_p1  ;;  %s152_s23 = sshll.u32 %s2205_s22, 4  ;;  %s153_s23 = int_to_ptr.vmem [resolvable:$true] %s152_s23 }
   0x6   : > { %s164_s26 = sshll.u32 %s3460_s3, 4  ;;  %s2206_s27 = smov [#allocation4]   ;;  %s165_s26 = int_to_ptr.hbm [resolvable:$true] %s164_s26 }
   0x7   : > { %p2100_p4 = pneg %p2251_p3  ;;  %s166_s28 = sshll.u32 %s2206_s27, 4  ;;  %s167_s28 = int_to_ptr.vmem [resolvable:$true] %s166_s28 }
   0x8   : > { %s2207_s29 = smov 384   ;;  %s2208_s30 = smov 24  }
   0x9   : > { %p2101_p5 = pnand %p2247_p2, %p2100_p4  ;;  %s2209_s5 = smov 128  }
   0xa   : > { %s2210_s6 = smov 8   ;;  %191 = sbr.rel (%p2251_p3) target bundleno = 905 (0x389), region = 36 }
   0xb   : > { %2103 = dma.hbm_to_vmem [thread:$0]  (!%p2101_p5), %s151_s18, 24576, %s153_s23, [#allocation3], %s2207_s29, %s2207_s29, %s2208_s30  }
   0xc   : > { %2106 = dma.hbm_to_vmem [thread:$0]  (!%p2101_p5), %s165_s26, 6144, %s167_s28, [#allocation5], %s2209_s5, %s2209_s5, %s2210_s6  }
   0xf   : > { %2194 = dma.done.wait (%p2247_p2), [#allocation3], 24576  }
  0x10   : > { %2196 = vsyncadd (%p2247_p2), [#allocation3], 4294942720 }
  0x11   : > { %2198 = dma.done.wait (%p2247_p2), [#allocation5], 6144  }
  0x12   : > { %2200 = vsyncadd (%p2247_p2), [#allocation5], 4294961152  ;;  %s2015_s7 = sshll.u32 %s2006_s19, 4  ;;  %vm308_vm0 = vcmask 1043456   ;;  %vm259_vm1 = vcmask 31744   ;;  %v2285_v0 = vld [vmem:[%s3458_s1] sm:$0xff] }
  0x13   : > { %p224_p6 = scmp.lt.s32.totalorder %s2015_s7, 31  ;;  %2019 = vmatpush.msk.msra.mxu0 %vm308_vm0, %v2285_v0  ;;  %2089 = vmatpush.msk.msra.mxu3 %vm308_vm0, %v2285_v0  ;;  %v2300_v3 = vld [vmem:[%s3458_s1 + $0x18] sm:$0xff]  ;;  %v2311_v4 = vld [vmem:[%s3458_s1 + $0x8] sm:$0xff]  ;;  %v2356_v11 = vld [vmem:[%s3458_s1 + $0x10] sm:$0xff]  ;;  %v2469_v59 = vperm.slane %v2285_v0, 4 }
  0x14   : > { %2090 = vmatpush.msk.msra.mxu1 %vm308_vm0, %v2311_v4  ;;  %2091 = vmatpush.msk.msra.mxu2 %vm308_vm0, %v2356_v11  ;;  %v690_v17 = vld [vmem:[#allocation2 + $0x168] sm:$0xff]  ;;  %v687_v18 = vld [vmem:[#allocation2 + $0x150] sm:$0xff]  ;;  %v684_v19 = vld [vmem:[#allocation2 + $0x138] sm:$0xff] }
  0x15   : > { %s3640_s7 = smov (!%p224_p6, %s2015_s7), 31  ;;  %2070 = vmatpush.msk.msrb.mxu3 %vm308_vm0, %v2300_v3  ;;  %2036 = vmatpush.msk.msrb.mxu0 %vm308_vm0, %v2311_v4  ;;  %v834_v21 = vld [vmem:[#allocation2 + $0x5e8] sm:$0xff]  ;;  %v681_v22 = vld [vmem:[#allocation2 + $0x120] sm:$0xff]  ;;  %v675_v24 = vld [vmem:[#allocation2 + $0xf0] sm:$0xff] }
  0x16   : > { %s2016_s8 = sshll.u32 %s3640_s7, 3  ;;  %v678_v23 = vld [vmem:[#allocation2 + $0x108] sm:$0xff]  ;;  %v672_v25 = vld [vmem:[#allocation2 + $0xd8] sm:$0xff]  ;;  %v831_v27 = vld [vmem:[#allocation2 + $0x5d0] sm:$0xff] }
  0x17   : > { %s2280_s11 = scalar_lea.vmem %s3457_s0, %s2016_s8  ;;  %v669_v28 = vld [vmem:[#allocation2 + $0xc0] sm:$0xff]  ;;  %v666_v29 = vld [vmem:[#allocation2 + $0xa8] sm:$0xff]  ;;  %v663_v30 = vld [vmem:[#allocation2 + $0x90] sm:$0xff]  ;;  %s3421_s5 = scalar_lea.vmem %s3461_s4, %s2016_s8 }
  0x18   : > { %v2288_v1 = vld [vmem:[%s2280_s11] sm:$0xff]  ;;  %v2320_v5 = vld [vmem:[%s2280_s11 + $0x8] sm:$0xff]  ;;  %v2332_v7 = vld [vmem:[%s2280_s11 + $0x10] sm:$0xff] }
  0x19   : > { %v2291_v2 = vld [vmem:[%s2280_s11 + $0x20] sm:$0xff]  ;;  %2020 = vmatmul.msk.f32.vlgmr.msra.gmra.mxu0 %vm259_vm1, %v2288_v1  ;;  %v2323_v6 = vld [vmem:[%s2280_s11 + $0x28] sm:$0xff]  ;;  %v2335_v8 = vld [vmem:[%s2280_s11 + $0x30] sm:$0xff] }
  0x1a   : > { %2024 = vmatmul.msk.f32.vlgmr.msra.gmra.mxu3 %vm259_vm1, %v2291_v2  ;;  %2041 = vmatmul.msk.f32.vlgmr.msra.gmra.mxu1 %vm259_vm1, %v2291_v2  ;;  %v2344_v9 = vld [vmem:[%s2280_s11 + $0x18] sm:$0xff]  ;;  %v2367_v12 = vld [vmem:[%s2280_s11 + $0x40] sm:$0xff]  ;;  %v2378_v13 = vld [vmem:[%s2280_s11 + $0x48] sm:$0xff] }
  0x1b   : > { %v2347_v10 = vld [vmem:[%s2280_s11 + $0x38] sm:$0xff]  ;;  %2053 = vmatpush.msk.msra.mxu0 %vm308_vm0, %v2356_v11  ;;  %2058 = vmatmul.msk.f32.vlgmr.msra.gmra.mxu2 %vm259_vm1, %v2291_v2  ;;  %v2389_v14 = vld [vmem:[%s2280_s11 + $0x50] sm:$0xff]  ;;  %v2411_v16 = vld [vmem:[%s2280_s11 + $0x60] sm:$0xff] }
  0x1c   : > { %v2400_v15 = vld [vmem:[%s2280_s11 + $0x58] sm:$0xff]  ;;  %v2422_v20 = vld [vmem:[%s2280_s11 + $0x68] sm:$0xff]  ;;  %1035 = vmatpush.msra.mxu3 %v834_v21  ;;  %v2433_v26 = vld [vmem:[%s2280_s11 + $0x70] sm:$0xff] }
  0x1d   : > { %v660_v31 = vld [vmem:[#allocation2 + $0x78] sm:$0xff]  ;;  %v657_v34 = vld [vmem:[#allocation2 + $0x60] sm:$0xff]  ;;  %v654_v35 = vld [vmem:[#allocation2 + $0x48] sm:$0xff] }
  0x1e   : > { %1036 = vmatpush.msra.mxu3 %v831_v27  ;;  %v2444_v32 = vld [vmem:[%s2280_s11 + $0x78] sm:$0xff]  ;;  %v651_v36 = vld [vmem:[#allocation2 + $0x30] sm:$0xff]  ;;  %v825_v38 = vld [vmem:[#allocation2 + $0x5a0] sm:$0xff] }
  0x1f   : > { %v828_v33 = vld [vmem:[#allocation2 + $0x5b8] sm:$0xff]  ;;  %v645_v39 = vld [vmem:[#allocation2] sm:$0xff]  ;;  %v738_v40 = vld [vmem:[#allocation2 + $0x2e8] sm:$0xff] }
  0x20   : > { %1037 = vmatpush.msra.mxu3 %v828_v33  ;;  %v648_v37 = vld [vmem:[#allocation2 + $0x18] sm:$0xff]  ;;  %905 = vmatpush.msrb.mxu1 %v738_v40  ;;  %v735_v41 = vld [vmem:[#allocation2 + $0x2d0] sm:$0xff]  ;;  %v786_v43 = vld [vmem:[#allocation2 + $0x468] sm:$0xff] }
  0x21   : > { %2021 = vmatmul.msk.f32.gmra.mxu0 %vm259_vm1, %v2320_v5  ;;  %v732_v42 = vld [vmem:[#allocation2 + $0x2b8] sm:$0xff]  ;;  %v822_v44 = vld [vmem:[#allocation2 + $0x588] sm:$0xff]  ;;  %v729_v45 = vld [vmem:[#allocation2 + $0x2a0] sm:$0xff]  ;;  %970 = vmatpush.msrb.mxu2 %v786_v43 }
  0x22   : > { %2025 = vmatmul.msk.f32.gmra.mxu3 %vm259_vm1, %v2323_v6  ;;  %2042 = vmatmul.msk.f32.gmra.mxu1 %vm259_vm1, %v2323_v6  ;;  %v726_v46 = vld [vmem:[#allocation2 + $0x288] sm:$0xff]  ;;  %v723_v47 = vld [vmem:[#allocation2 + $0x270] sm:$0xff]  ;;  %v720_v49 = vld [vmem:[#allocation2 + $0x258] sm:$0xff] }
  0x23   : > { %2059 = vmatmul.msk.f32.gmra.mxu2 %vm259_vm1, %v2323_v6  ;;  %1038 = vmatpush.msra.mxu3 %v825_v38  ;;  %v783_v48 = vld [vmem:[#allocation2 + $0x450] sm:$0xff]  ;;  %v717_v51 = vld [vmem:[#allocation2 + $0x240] sm:$0xff]  ;;  %v780_v52 = vld [vmem:[#allocation2 + $0x438] sm:$0xff] }
  0x24   : > { %906 = vmatpush.msrb.mxu1 %v735_v41  ;;  %971 = vmatpush.msrb.mxu2 %v783_v48  ;;  %v819_v50 = vld [vmem:[#allocation2 + $0x570] sm:$0xff]  ;;  %v714_v53 = vld [vmem:[#allocation2 + $0x228] sm:$0xff]  ;;  %v708_v55 = vld [vmem:[#allocation2 + $0x1f8] sm:$0xff] }
  0x25   : > { %1039 = vmatpush.msra.mxu3 %v822_v44  ;;  %v711_v54 = vld [vmem:[#allocation2 + $0x210] sm:$0xff]  ;;  %v777_v56 = vld [vmem:[#allocation2 + $0x420] sm:$0xff]  ;;  %v816_v57 = vld [vmem:[#allocation2 + $0x558] sm:$0xff] }
  0x26   : > { %907 = vmatpush.msrb.mxu1 %v732_v42  ;;  %972 = vmatpush.msrb.mxu2 %v780_v52  ;;  %v705_v58 = vld [vmem:[#allocation2 + $0x1e0] sm:$0xff]  ;;  %v702_v60 = vld [vmem:[#allocation2 + $0x1c8] sm:$0xff]  ;;  %v699_v61 = vld [vmem:[#allocation2 + $0x1b0] sm:$0xff] }
  0x27   : > { %1040 = vmatpush.msra.mxu3 %v819_v50  ;;  %v771_v21 = vld [vmem:[#allocation2 + $0x3f0] sm:$0xff]  ;;  %v753_v38 = vld [vmem:[#allocation2 + $0x360] sm:$0xff]  ;;  %v750_v40 = vld [vmem:[#allocation2 + $0x348] sm:$0xff] }
  0x28   : > { %908 = vmatpush.msrb.mxu1 %v729_v45  ;;  %973 = vmatpush.msrb.mxu2 %v777_v56  ;;  %v759_v33 = vld [vmem:[#allocation2 + $0x390] sm:$0xff]  ;;  %v741_v48 = vld [vmem:[#allocation2 + $0x300] sm:$0xff] }
  0x29   : > { %2022 = vmatmul.msk.f32.gmra.mxu0 %vm259_vm1, %v2332_v7  ;;  %1041 = vmatpush.msra.mxu3 %v816_v57  ;;  %v747_v43 = vld [vmem:[#allocation2 + $0x330] sm:$0xff] }
  0x2a   : > { %2026 = vmatmul.msk.f32.gmra.mxu3 %vm259_vm1, %v2335_v8  ;;  %2043 = vmatmul.msk.f32.gmra.mxu1 %vm259_vm1, %v2335_v8 }
  0x2b   : > { %2060 = vmatmul.msk.f32.gmra.mxu2 %vm259_vm1, %v2335_v8  ;;  %909 = vmatpush.msrb.mxu1 %v726_v46 }
  0x2d   : > { %910 = vmatpush.msrb.mxu1 %v723_v47 }
  0x2f   : > { %911 = vmatpush.msrb.mxu1 %v720_v49 }
  0x31   : > { %2023 = vmatmul.msk.f32.gmra.mxu0 %vm259_vm1, %v2344_v9  ;;  %912 = vmatpush.msrb.mxu1 %v717_v51 }
  0x32   : > { %2027 = vmatmul.msk.f32.gmra.mxu3 %vm259_vm1, %v2347_v10  ;;  %2044 = vmatmul.msk.f32.gmra.mxu1 %vm259_vm1, %v2347_v10 }
  0x33   : > { %2061 = vmatmul.msk.f32.gmra.mxu2 %vm259_vm1, %v2347_v10  ;;  %913 = vmatpush.msrb.mxu1 %v714_v53 }
  0x35   : > { %914 = vmatpush.msrb.mxu1 %v711_v54 }
  0x37   : > { %915 = vmatpush.msrb.mxu1 %v708_v55 }
  0x39   : > { %2037 = vmatmul.msk.f32.vlgmr.msrb.gmra.mxu0 %vm259_vm1, %v2288_v1  ;;  %916 = vmatpush.msrb.mxu1 %v705_v58 }
  0x3a   : > { %2028 = vmatmul.msk.f32.gmra.mxu3 %vm259_vm1, %v2367_v12  ;;  %2045 = vmatmul.msk.f32.gmra.mxu1 %vm259_vm1, %v2367_v12 }
  0x3b   : > { %2062 = vmatmul.msk.f32.gmra.mxu2 %vm259_vm1, %v2367_v12  ;;  %840 = vmatpush.msrb.mxu0 %v690_v17  ;;  %v693_v17 = vld [vmem:[#allocation2 + $0x180] sm:$0xff] }
  0x3c   : > { %917 = vmatpush.msrb.mxu1 %v702_v60 }
  0x3d   : > { %841 = vmatpush.msrb.mxu0 %v687_v18 }
  0x3e   : > { %918 = vmatpush.msrb.mxu1 %v699_v61 }
  0x3f   : > { %842 = vmatpush.msrb.mxu0 %v684_v19 }
  0x41   : > { %2038 = vmatmul.msk.f32.gmra.mxu0 %vm259_vm1, %v2320_v5 }
  0x42   : > { %2029 = vmatmul.msk.f32.gmra.mxu3 %vm259_vm1, %v2378_v13  ;;  %2046 = vmatmul.msk.f32.gmra.mxu1 %vm259_vm1, %v2378_v13 }
  0x43   : > { %2063 = vmatmul.msk.f32.gmra.mxu2 %vm259_vm1, %v2378_v13  ;;  %843 = vmatpush.msrb.mxu0 %v681_v22 }
  0x45   : > { %844 = vmatpush.msrb.mxu0 %v678_v23  ;;  %v768_v23 = vld [vmem:[#allocation2 + $0x3d8] sm:$0xff] }
  0x47   : > { %845 = vmatpush.msrb.mxu0 %v675_v24 }
  0x49   : > { %2039 = vmatmul.msk.f32.gmra.mxu0 %vm259_vm1, %v2332_v7 }
  0x4a   : > { %2030 = vmatmul.msk.f32.gmra.mxu3 %vm259_vm1, %v2389_v14  ;;  %2047 = vmatmul.msk.f32.gmra.mxu1 %vm259_vm1, %v2389_v14 }
  0x4b   : > { %2064 = vmatmul.msk.f32.gmra.mxu2 %vm259_vm1, %v2389_v14  ;;  %846 = vmatpush.msrb.mxu0 %v672_v25 }
  0x4d   : > { %847 = vmatpush.msrb.mxu0 %v669_v28 }
  0x4f   : > { %848 = vmatpush.msrb.mxu0 %v666_v29  ;;  %v765_v29 = vld [vmem:[#allocation2 + $0x3c0] sm:$0xff] }
  0x51   : > { %2040 = vmatmul.msk.f32.gmra.mxu0 %vm259_vm1, %v2344_v9 }
  0x52   : > { %2031 = vmatmul.msk.f32.gmra.mxu3 %vm259_vm1, %v2400_v15  ;;  %2048 = vmatmul.msk.f32.gmra.mxu1 %vm259_vm1, %v2400_v15 }
  0x53   : > { %2065 = vmatmul.msk.f32.gmra.mxu2 %vm259_vm1, %v2400_v15  ;;  %849 = vmatpush.msrb.mxu0 %v663_v30  ;;  %v807_v30 = vld [vmem:[#allocation2 + $0x510] sm:$0xff] }
  0x55   : > { %850 = vmatpush.msrb.mxu0 %v660_v31 }
  0x57   : > { %851 = vmatpush.msrb.mxu0 %v657_v34 }
  0x59   : > { %2054 = vmatmul.msk.f32.vlgmr.msra.gmra.mxu0 %vm259_vm1, %v2288_v1 }
  0x5a   : > { %2032 = vmatmul.msk.f32.gmra.mxu3 %vm259_vm1, %v2411_v16  ;;  %2049 = vmatmul.msk.f32.gmra.mxu1 %vm259_vm1, %v2411_v16 }
  0x5b   : > { %2066 = vmatmul.msk.f32.gmra.mxu2 %vm259_vm1, %v2411_v16  ;;  %852 = vmatpush.msrb.mxu0 %v654_v35 }
  0x5d   : > { %853 = vmatpush.msrb.mxu0 %v651_v36  ;;  %v756_v36 = vld [vmem:[#allocation2 + $0x378] sm:$0xff] }
  0x5f   : > { %854 = vmatpush.msrb.mxu0 %v648_v37 }
  0x61   : > { %2055 = vmatmul.msk.f32.gmra.mxu0 %vm259_vm1, %v2320_v5 }
  0x62   : > { %2033 = vmatmul.msk.f32.gmra.mxu3 %vm259_vm1, %v2422_v20  ;;  %2050 = vmatmul.msk.f32.gmra.mxu1 %vm259_vm1, %v2422_v20 }
  0x63   : > { %855 = vmatpush.msrb.mxu0 %v645_v39  ;;  %2067 = vmatmul.msk.f32.gmra.mxu2 %vm259_vm1, %v2422_v20  ;;  %v2495_v39 = vperm.slane %v2311_v4, 4  ;;  %v801_v4 = vld [vmem:[#allocation2 + $0x4e0] sm:$0xff] }
  0x69   : > { %2056 = vmatmul.msk.f32.gmra.mxu0 %vm259_vm1, %v2332_v7 }
  0x6a   : > { %2034 = vmatmul.msk.f32.gmra.mxu3 %vm259_vm1, %v2433_v26  ;;  %2051 = vmatmul.msk.f32.gmra.mxu1 %vm259_vm1, %v2433_v26 }
  0x6b   : > { %2068 = vmatmul.msk.f32.gmra.mxu2 %vm259_vm1, %v2433_v26 }
  0x71   : > { %2057 = vmatmul.msk.f32.gmra.mxu0 %vm259_vm1, %v2344_v9 }
  0x72   : > { %2035 = vmatmul.msk.f32.gmra.mxu3 %vm259_vm1, %v2444_v32  ;;  %2052 = vmatmul.msk.f32.gmra.mxu1 %vm259_vm1, %v2444_v32 }
  0x73   : > { %2069 = vmatmul.msk.f32.gmra.mxu2 %vm259_vm1, %v2444_v32 }
  0x7a   : > { %2071 = vmatmul.msk.f32.vlgmr.msrb.gmra.mxu3 %vm259_vm1, %v2288_v1  ;;  %v696_v1 = vld [vmem:[#allocation2 + $0x198] sm:$0xff] }
  0x7b   : > { %919 = vmatpush.msrb.mxu1 %v696_v1 }
  0x7d   : > { %920 = vmatpush.msrb.mxu1 %v693_v17 }
  0x82   : > { %2072 = vmatmul.msk.f32.gmra.mxu3 %vm259_vm1, %v2320_v5 }
  0x8a   : > { %2073 = vmatmul.msk.f32.gmra.mxu3 %vm259_vm1, %v2332_v7  ;;  %v774_v7 = vld [vmem:[#allocation2 + $0x408] sm:$0xff] }
  0x8b   : > { %974 = vmatpush.msrb.mxu2 %v774_v7 }
  0x8d   : > { %975 = vmatpush.msrb.mxu2 %v771_v21  ;;  %v2537_v21 = vperm.slane %v2356_v11, 4 }
  0x8f   : > { %976 = vmatpush.msrb.mxu2 %v768_v23 }
  0x91   : > { %977 = vmatpush.msrb.mxu2 %v765_v29  ;;  %v789_v29 = vld [vmem:[#allocation2 + $0x480] sm:$0xff] }
  0x92   : > { %2074 = vmatmul.msk.f32.gmra.mxu3 %vm259_vm1, %v2344_v9  ;;  %v813_v9 = vld [vmem:[#allocation2 + $0x540] sm:$0xff] }
  0x93   : > { %1042 = vmatpush.msra.mxu3 %v813_v9 }
  0x96   : > { %v338_v62 = vpop.f32.mrf.mxu0 }
  0x97   : > { %v339_v63 = vadd.f32 %v338_v62, %v2469_v59  ;;  %v415_v49 = vpop.f32.mrf.mxu1 }
  0x99   : > { %v2472_v5 = vmax.f32 %v339_v63, 0.0 }
  0x9a   : > { %2075 = vmatmul.msk.f32.gmra.mxu3 %vm259_vm1, %v2291_v2  ;;  %v810_v2 = vld [vmem:[#allocation2 + $0x528] sm:$0xff] }
  0x9b   : > { %856 = vmatmul.f32.vlgmr.msrb.gmra.mxu0 %v2472_v5  ;;  %1043 = vmatpush.msra.mxu3 %v810_v2  ;;  %v416_v2 = vadd.f32 %v415_v49, %v2495_v39 }
  0x9d   : > { %v350_v0 = vpop.f32.mrf.mxu3  ;;  %1044 = vmatpush.msra.mxu3 %v807_v30 }
  0x9e   : > { %v341_v18 = vpop.f32.mrf.mxu0  ;;  %v351_v42 = vadd.f32 %v350_v0, %v2469_v59 }
  0x9f   : > { %v342_v19 = vadd.f32 %v341_v18, %v2469_v59  ;;  %v418_v57 = vpop.f32.mrf.mxu1 }
  0xa0   : > { %v2500_v46 = vmax.f32 %v351_v42, 0.0  ;;  %v685_v42 = vld [vmem:[#allocation2 + $0x140] sm:$0xff] }
  0xa1   : > { %v2478_v22 = vmax.f32 %v342_v19, 0.0 }
  0xa2   : > { %2076 = vmatmul.msk.f32.gmra.mxu3 %vm259_vm1, %v2323_v6  ;;  %v762_v6 = vld [vmem:[#allocation2 + $0x3a8] sm:$0xff] }
  0xa3   : > { %859 = vmatmul.f32.gmra.mxu0 %v2478_v22  ;;  %978 = vmatpush.msrb.mxu2 %v762_v6 }
  0xa5   : > { %v353_v24 = vpop.f32.mrf.mxu3  ;;  %979 = vmatpush.msrb.mxu2 %v759_v33  ;;  %v2557_v33 = vpop.f32.mrf.mxu2 }
  0xa6   : > { %v344_v25 = vpop.f32.mrf.mxu0  ;;  %v354_v51 = vadd.f32 %v353_v24, %v2469_v59 }
  0xa7   : > { %v345_v27 = vadd.f32 %v344_v25, %v2469_v59  ;;  %980 = vmatpush.msrb.mxu2 %v756_v36  ;;  %v421_v17 = vpop.f32.mrf.mxu1 }
  0xa8   : > { %v2510_v54 = vmax.f32 %v354_v51, 0.0  ;;  %v679_v51 = vld [vmem:[#allocation2 + $0x110] sm:$0xff] }
  0xa9   : > { %v2484_v28 = vmax.f32 %v345_v27, 0.0  ;;  %981 = vmatpush.msrb.mxu2 %v753_v38  ;;  %v2545_v27 = vmax.f32 %v416_v2, 0.0  ;;  %v688_v38 = vld [vmem:[#allocation2 + $0x158] sm:$0xff]  ;;  %v667_v2 = vld [vmem:[#allocation2 + $0xb0] sm:$0xff] }
  0xaa   : > { %2077 = vmatmul.msk.f32.gmra.mxu3 %vm259_vm1, %v2335_v8  ;;  %v804_v8 = vld [vmem:[#allocation2 + $0x4f8] sm:$0xff]  ;;  %3523 = vst [vmem:[#allocation10_spill] sm:$0xff] %v2510_v54 }
  0xab   : > { %862 = vmatmul.f32.gmra.mxu0 %v2484_v28  ;;  %1045 = vmatpush.msra.mxu3 %v804_v8  ;;  %3528 = vst [vmem:[#allocation15_spill] sm:$0xff] %v2545_v27 }
  0xac   : > { %982 = vmatpush.msrb.mxu2 %v750_v40 }
  0xad   : > { %v356_v31 = vpop.f32.mrf.mxu3  ;;  %1046 = vmatpush.msra.mxu3 %v801_v4 }
  0xae   : > { %v347_v34 = vpop.f32.mrf.mxu0  ;;  %983 = vmatpush.msrb.mxu2 %v747_v43  ;;  %v357_v58 = vadd.f32 %v356_v31, %v2469_v59  ;;  %v419_v31 = vadd.f32 %v418_v57, %v2495_v39 }
  0xaf   : > { %v348_v35 = vadd.f32 %v347_v34, %v2469_v59  ;;  %v424_v30 = vpop.f32.mrf.mxu1 }
  0xb0   : > { %v2520_v62 = vmax.f32 %v357_v58, 0.0  ;;  %v2563_v40 = vmax.f32 %v419_v31, 0.0  ;;  %v784_v58 = vld [vmem:[#allocation2 + $0x458] sm:$0xff]  ;;  %v781_v31 = vld [vmem:[#allocation2 + $0x440] sm:$0xff] }
  0xb1   : > { %v2490_v37 = vmax.f32 %v348_v35, 0.0  ;;  %v691_v35 = vld [vmem:[#allocation2 + $0x170] sm:$0xff] }
  0xb2   : > { %2078 = vmatmul.msk.f32.gmra.mxu3 %vm259_vm1, %v2347_v10  ;;  %v744_v10 = vld [vmem:[#allocation2 + $0x318] sm:$0xff]  ;;  %1100 = vmatpush.msra.mxu0 %v691_v35  ;;  %3531 = vst [vmem:[#allocation18_spill] sm:$0xff] %v2563_v40  ;;  %v661_v35 = vld [vmem:[#allocation2 + $0x80] sm:$0xff] }
  0xb3   : > { %3521 = vst [vmem:[#allocation8_spill] sm:$0xff] %v2490_v37  ;;  %865 = vmatmul.f32.gmra.mxu0 %v2490_v37  ;;  %984 = vmatpush.msrb.mxu2 %v744_v10  ;;  %v682_v10 = vld [vmem:[#allocation2 + $0x128] sm:$0xff] }
  0xb4   : > { %1101 = vmatpush.msra.mxu0 %v688_v38  ;;  %v658_v38 = vld [vmem:[#allocation2 + $0x68] sm:$0xff] }
  0xb5   : > { %v359_v41 = vpop.f32.mrf.mxu3  ;;  %985 = vmatpush.msrb.mxu2 %v741_v48  ;;  %v422_v48 = vadd.f32 %v421_v17, %v2495_v39 }
  0xb6   : > { %v403_v44 = vpop.f32.mrf.mxu0  ;;  %v360_v7 = vadd.f32 %v359_v41, %v2469_v59  ;;  %v787_v41 = vld [vmem:[#allocation2 + $0x470] sm:$0xff]  ;;  %1102 = vmatpush.msra.mxu0 %v685_v42  ;;  %v481_v42 = vadd.f32 %v2557_v33, %v2537_v21  ;;  %v2624_v33 = vperm.slane %v2300_v3, 4 }
  0xb7   : > { %v404_v45 = vadd.f32 %v403_v44, %v2495_v39  ;;  %1230 = vmatpush.msra.mxu2 %v787_v41  ;;  %v427_v4 = vpop.f32.mrf.mxu1 }
  0xb8   : > { %v2530_v18 = vmax.f32 %v360_v7, 0.0  ;;  %1103 = vmatpush.msra.mxu0 %v682_v10  ;;  %v670_v7 = vld [vmem:[#allocation2 + $0xc8] sm:$0xff] }
  0xb9   : > { %v2502_v47 = vmax.f32 %v404_v45, 0.0  ;;  %v835_v45 = vld [vmem:[#allocation2 + $0x5f0] sm:$0xff]  ;;  %1231 = vmatpush.msra.mxu2 %v784_v58  ;;  %v826_v58 = vld [vmem:[#allocation2 + $0x5a8] sm:$0xff] }
  0xba   : > { %2079 = vmatmul.msk.f32.gmra.mxu3 %vm259_vm1, %v2367_v12  ;;  %v798_v12 = vld [vmem:[#allocation2 + $0x4c8] sm:$0xff]  ;;  %3526 = vst [vmem:[#allocation13_spill] sm:$0xff] %v2530_v18  ;;  %1104 = vmatpush.msra.mxu0 %v679_v51 }
  0xbb   : > { %3522 = vst [vmem:[#allocation9_spill] sm:$0xff] %v2502_v47  ;;  %868 = vmatmul.f32.gmra.mxu0 %v2500_v46  ;;  %921 = vmatmul.f32.vlgmr.msrb.gmra.mxu1 %v2502_v47 }
  0xbc   : > { %1047 = vmatpush.msra.mxu3 %v798_v12  ;;  %v676_v12 = vld [vmem:[#allocation2 + $0xf8] sm:$0xff]  ;;  %1232 = vmatpush.msra.mxu2 %v781_v31 }
  0xbd   : > { %v362_v50 = vpop.f32.mrf.mxu3  ;;  %1105 = vmatpush.msra.mxu0 %v676_v12 }
  0xbe   : > { %v406_v52 = vpop.f32.mrf.mxu0  ;;  %v363_v24 = vadd.f32 %v362_v50, %v2469_v59  ;;  %v739_v50 = vld [vmem:[#allocation2 + $0x2f0] sm:$0xff] }
  0xbf   : > { %v407_v53 = vadd.f32 %v406_v52, %v2495_v39  ;;  %v2579_v52 = vpop.f32.mrf.mxu2  ;;  %1165 = vmatpush.msra.mxu1 %v739_v50  ;;  %v652_v50 = vld [vmem:[#allocation2 + $0x38] sm:$0xff] }
  0xc0   : > { %v2548_v11 = vmax.f32 %v363_v24, 0.0  ;;  %v484_v3 = vadd.f32 %v2579_v52, %v2537_v21  ;;  %v823_v52 = vld [vmem:[#allocation2 + $0x590] sm:$0xff] }
  0xc1   : > { %v2512_v55 = vmax.f32 %v407_v53, 0.0 }
  0xc2   : > { %2080 = vmatmul.msk.f32.gmra.mxu3 %vm259_vm1, %v2378_v13  ;;  %v795_v13 = vld [vmem:[#allocation2 + $0x4b0] sm:$0xff]  ;;  %3529 = vst [vmem:[#allocation16_spill] sm:$0xff] %v2548_v11 }
  0xc3   : > { %3524 = vst [vmem:[#allocation11_spill] sm:$0xff] %v2512_v55  ;;  %871 = vmatmul.f32.gmra.mxu0 %v2510_v54  ;;  %924 = vmatmul.f32.gmra.mxu1 %v2512_v55 }
  0xc4   : > { %1048 = vmatpush.msra.mxu3 %v795_v13 }
  0xc5   : > { %v365_v56 = vpop.f32.mrf.mxu3 }
  0xc6   : > { %v409_v60 = vpop.f32.mrf.mxu0  ;;  %v366_v36 = vadd.f32 %v365_v56, %v2469_v59  ;;  %v2581_v56 = vmax.f32 %v422_v48, 0.0 }
  0xc7   : > { %v410_v61 = vadd.f32 %v409_v60, %v2495_v39  ;;  %v673_v60 = vld [vmem:[#allocation2 + $0xe0] sm:$0xff] }
  0xc8   : > { %v2566_v43 = vmax.f32 %v366_v36, 0.0  ;;  %3533 = vst [vmem:[#allocation20_spill] sm:$0xff] %v2581_v56  ;;  %1106 = vmatpush.msra.mxu0 %v673_v60 }
  0xc9   : > { %v2522_v63 = vmax.f32 %v410_v61, 0.0 }
  0xca   : > { %2081 = vmatmul.msk.f32.gmra.mxu3 %vm259_vm1, %v2389_v14  ;;  %v792_v14 = vld [vmem:[#allocation2 + $0x498] sm:$0xff]  ;;  %1107 = vmatpush.msra.mxu0 %v670_v7  ;;  %v730_v7 = vld [vmem:[#allocation2 + $0x2a8] sm:$0xff] }
  0xcb   : > { %3525 = vst [vmem:[#allocation12_spill] sm:$0xff] %v2522_v63  ;;  %874 = vmatmul.f32.gmra.mxu0 %v2520_v62  ;;  %927 = vmatmul.f32.gmra.mxu1 %v2522_v63 }
  0xcc   : > { %1049 = vmatpush.msra.mxu3 %v792_v14  ;;  %v736_v14 = vld [vmem:[#allocation2 + $0x2d8] sm:$0xff]  ;;  %1108 = vmatpush.msra.mxu0 %v667_v2 }
  0xcd   : > { %v368_v1 = vpop.f32.mrf.mxu3  ;;  %1166 = vmatpush.msra.mxu1 %v736_v14 }
  0xce   : > { %v412_v9 = vpop.f32.mrf.mxu0  ;;  %1050 = vmatpush.msra.mxu3 %v789_v29 }
  0xcf   : > { %v413_v0 = vadd.f32 %v412_v9, %v2495_v39  ;;  %v425_v9 = vadd.f32 %v424_v30, %v2495_v39  ;;  %v2601_v30 = vpop.f32.mrf.mxu2 }
  0xd0   : > { %1295 = vmatpush.msrb.mxu3 %v835_v45  ;;  %v733_v45 = vld [vmem:[#allocation2 + $0x2c0] sm:$0xff] }
  0xd1   : > { %v2532_v19 = vmax.f32 %v413_v0, 0.0  ;;  %v430_v0 = vpop.f32.mrf.mxu1  ;;  %1167 = vmatpush.msra.mxu1 %v733_v45  ;;  %v724_v45 = vld [vmem:[#allocation2 + $0x278] sm:$0xff] }
  0xd2   : > { %2082 = vmatmul.msk.f32.gmra.mxu3 %vm259_vm1, %v2400_v15  ;;  %v431_v60 = vadd.f32 %v430_v0, %v2495_v39  ;;  %v2641_v0 = vmax.f32 %v484_v3, 0.0  ;;  %v715_v3 = vld [vmem:[#allocation2 + $0x230] sm:$0xff] }
  0xd3   : > { %3527 = vst [vmem:[#allocation14_spill] sm:$0xff] %v2532_v19  ;;  %877 = vmatmul.f32.gmra.mxu0 %v2530_v18  ;;  %930 = vmatmul.f32.gmra.mxu1 %v2532_v19 }
  0xd4   : > { %1168 = vmatpush.msra.mxu1 %v730_v7  ;;  %3542 = vst [vmem:[#allocation29_spill] sm:$0xff] %v2641_v0 }
  0xd5   : > { %v2542_v23 = vpop.f32.mrf.mxu3 }
  0xd6   : > { %v468_v25 = vpop.f32.mrf.mxu0 }
  0xd7   : > { %v469_v15 = vadd.f32 %v468_v25, %v2537_v21  ;;  %v664_v25 = vld [vmem:[#allocation2 + $0x98] sm:$0xff] }
  0xd8   : > { %1109 = vmatpush.msra.mxu0 %v664_v25 }
  0xd9   : > { %v2550_v6 = vmax.f32 %v469_v15, 0.0  ;;  %v2598_v15 = vmax.f32 %v425_v9, 0.0  ;;  %v433_v48 = vpop.f32.mrf.mxu1 }
  0xda   : > { %2083 = vmatmul.msk.f32.gmra.mxu3 %vm259_vm1, %v2411_v16  ;;  %1110 = vmatpush.msra.mxu0 %v661_v35 }
  0xdb   : > { %3530 = vst [vmem:[#allocation17_spill] sm:$0xff] %v2550_v6  ;;  %880 = vmatmul.f32.gmra.mxu0 %v2548_v11  ;;  %933 = vmatmul.f32.gmra.mxu1 %v2545_v27 }
  0xdc   : > { %986 = vmatmul.f32.vlgmr.msrb.gmra.mxu2 %v2550_v6  ;;  %3536 = vst [vmem:[#allocation23_spill] sm:$0xff] %v2598_v15  ;;  %1111 = vmatpush.msra.mxu0 %v658_v38  ;;  %v727_v38 = vld [vmem:[#allocation2 + $0x290] sm:$0xff] }
  0xdd   : > { %v2560_v34 = vpop.f32.mrf.mxu3  ;;  %1169 = vmatpush.msra.mxu1 %v727_v38 }
  0xde   : > { %v471_v8 = vpop.f32.mrf.mxu0  ;;  %v375_v10 = vadd.f32 %v2560_v34, %v2469_v59  ;;  %v646_v34 = vld [vmem:[#allocation2 + $0x8] sm:$0xff] }
  0xdf   : > { %v472_v16 = vadd.f32 %v471_v8, %v2537_v21  ;;  %1170 = vmatpush.msra.mxu1 %v724_v45 }
  0xe0   : > { %v2626_v12 = vmax.f32 %v375_v10, 0.0 }
  0xe1   : > { %v2568_v44 = vmax.f32 %v472_v16, 0.0  ;;  %v428_v16 = vadd.f32 %v427_v4, %v2495_v39  ;;  %v778_v4 = vld [vmem:[#allocation2 + $0x428] sm:$0xff]  ;;  %v436_v25 = vpop.f32.mrf.mxu1 }
  0xe2   : > { %2084 = vmatmul.msk.f32.gmra.mxu3 %vm259_vm1, %v2422_v20  ;;  %v369_v20 = vadd.f32 %v368_v1, %v2469_v59  ;;  %v832_v1 = vld [vmem:[#allocation2 + $0x5d8] sm:$0xff]  ;;  %1233 = vmatpush.msra.mxu2 %v778_v4  ;;  %v721_v4 = vld [vmem:[#allocation2 + $0x260] sm:$0xff] }
  0xe3   : > { %3532 = vst [vmem:[#allocation19_spill] sm:$0xff] %v2568_v44  ;;  %883 = vmatmul.f32.gmra.mxu0 %v2566_v43  ;;  %936 = vmatmul.f32.gmra.mxu1 %v2563_v40  ;;  %v2619_v51 = vmax.f32 %v428_v16, 0.0 }
  0xe4   : > { %989 = vmatmul.f32.gmra.mxu2 %v2568_v44  ;;  %v2584_v61 = vmax.f32 %v369_v20, 0.0  ;;  %1296 = vmatpush.msrb.mxu3 %v832_v1  ;;  %v2621_v20 = vmax.f32 %v481_v42, 0.0 }
  0xe5   : > { %v2576_v49 = vpop.f32.mrf.mxu3  ;;  %3539 = vst [vmem:[#allocation26_spill] sm:$0xff] %v2619_v51  ;;  %1171 = vmatpush.msra.mxu1 %v721_v4 }
  0xe6   : > { %v474_v53 = vpop.f32.mrf.mxu0  ;;  %3534 = vst [vmem:[#allocation21_spill] sm:$0xff] %v2584_v61  ;;  %v378_v9 = vadd.f32 %v2576_v49, %v2469_v59  ;;  %v434_v49 = vadd.f32 %v433_v48, %v2495_v39  ;;  %v772_v48 = vld [vmem:[#allocation2 + $0x3f8] sm:$0xff] }
  0xe7   : > { %v475_v57 = vadd.f32 %v474_v53, %v2537_v21  ;;  %3540 = vst [vmem:[#allocation27_spill] sm:$0xff] %v2621_v20  ;;  %v649_v53 = vld [vmem:[#allocation2 + $0x20] sm:$0xff] }
  0xe8   : > { %v2657_v10 = vmax.f32 %v434_v49, 0.0 }
  0xe9   : > { %v2586_v13 = vmax.f32 %v475_v57, 0.0  ;;  %v489_v57 = vpop.f32.mrf.mxu2 }
  0xea   : > { %2085 = vmatmul.msk.f32.gmra.mxu3 %vm259_vm1, %v2433_v26  ;;  %v372_v26 = vadd.f32 %v2542_v23, %v2469_v59  ;;  %v829_v23 = vld [vmem:[#allocation2 + $0x5c0] sm:$0xff] }
  0xeb   : > { %3535 = vst [vmem:[#allocation22_spill] sm:$0xff] %v2586_v13  ;;  %886 = vmatmul.f32.gmra.mxu0 %v2584_v61  ;;  %939 = vmatmul.f32.gmra.mxu1 %v2581_v56 }
  0xec   : > { %992 = vmatmul.f32.gmra.mxu2 %v2586_v13  ;;  %v2603_v36 = vmax.f32 %v372_v26, 0.0  ;;  %1297 = vmatpush.msrb.mxu3 %v829_v23  ;;  %v2639_v26 = vmax.f32 %v431_v60, 0.0  ;;  %v487_v23 = vadd.f32 %v2601_v30, %v2537_v21  ;;  %v718_v30 = vld [vmem:[#allocation2 + $0x248] sm:$0xff] }
  0xed   : > { %v2594_v17 = vpop.f32.mrf.mxu3  ;;  %1172 = vmatpush.msra.mxu1 %v718_v30 }
  0xee   : > { %v477_v24 = vpop.f32.mrf.mxu0  ;;  %3537 = vst [vmem:[#allocation24_spill] sm:$0xff] %v2603_v36  ;;  %1298 = vmatpush.msrb.mxu3 %v826_v58  ;;  %v381_v16 = vadd.f32 %v2594_v17, %v2469_v59  ;;  %v820_v17 = vld [vmem:[#allocation2 + $0x578] sm:$0xff]  ;;  %v439_v58 = vpop.f32.mrf.mxu1 }
  0xef   : > { %v478_v29 = vadd.f32 %v477_v24, %v2537_v21  ;;  %3541 = vst [vmem:[#allocation28_spill] sm:$0xff] %v2639_v26  ;;  %v775_v24 = vld [vmem:[#allocation2 + $0x410] sm:$0xff]  ;;  %1173 = vmatpush.msra.mxu1 %v715_v3  ;;  %v440_v38 = vadd.f32 %v439_v58, %v2495_v39 }
  0xf0   : > { %1234 = vmatpush.msra.mxu2 %v775_v24  ;;  %1299 = vmatpush.msrb.mxu3 %v823_v52  ;;  %v712_v24 = vld [vmem:[#allocation2 + $0x218] sm:$0xff] }
  0xf1   : > { %v2605_v8 = vmax.f32 %v478_v29, 0.0  ;;  %v2643_v29 = vmax.f32 %v378_v9, 0.0  ;;  %v492_v31 = vpop.f32.mrf.mxu2  ;;  %1174 = vmatpush.msra.mxu1 %v712_v24 }
  0xf2   : > { %2086 = vmatmul.msk.f32.gmra.mxu3 %vm259_vm1, %v2444_v32  ;;  %v655_v32 = vld [vmem:[#allocation2 + $0x50] sm:$0xff]  ;;  %1235 = vmatpush.msra.mxu2 %v772_v48 }
  0xf3   : > { %3538 = vst [vmem:[#allocation25_spill] sm:$0xff] %v2605_v8  ;;  %889 = vmatmul.f32.gmra.mxu0 %v2603_v36  ;;  %942 = vmatmul.f32.gmra.mxu1 %v2598_v15  ;;  %v703_v48 = vld [vmem:[#allocation2 + $0x1d0] sm:$0xff] }
  0xf4   : > { %995 = vmatmul.f32.gmra.mxu2 %v2605_v8  ;;  %1112 = vmatpush.msra.mxu0 %v655_v32  ;;  %3543 = vst [vmem:[#allocation30_spill] sm:$0xff] %v2643_v29 }
  0xf5   : > { %v2613_v41 = vpop.f32.mrf.mxu3  ;;  %1300 = vmatpush.msrb.mxu3 %v820_v17  ;;  %v700_v17 = vld [vmem:[#allocation2 + $0x1b8] sm:$0xff] }
  0xf6   : > { %1113 = vmatpush.msra.mxu0 %v652_v50  ;;  %v2659_v50 = vmax.f32 %v487_v23, 0.0  ;;  %v384_v7 = vadd.f32 %v2613_v41, %v2469_v59  ;;  %v817_v59 = vld [vmem:[#allocation2 + $0x560] sm:$0xff]  ;;  %v706_v41 = vld [vmem:[#allocation2 + $0x1e8] sm:$0xff]  ;;  %v442_v45 = vpop.f32.mrf.mxu1 }
  0xf7   : > { %1301 = vmatpush.msrb.mxu3 %v817_v59  ;;  %v443_v24 = vadd.f32 %v442_v45, %v2495_v39 }
  0xf8   : > { %1114 = vmatpush.msra.mxu0 %v649_v53  ;;  %v2661_v53 = vmax.f32 %v381_v16, 0.0  ;;  %v2678_v23 = vmax.f32 %v384_v7, 0.0  ;;  %v814_v7 = vld [vmem:[#allocation2 + $0x548] sm:$0xff] }
  0xf9   : > { %1302 = vmatpush.msrb.mxu3 %v814_v7 }
  0xfa   : > { %1115 = vmatpush.msra.mxu0 %v646_v34  ;;  %v437_v34 = vadd.f32 %v436_v25, %v2495_v39  ;;  %v769_v25 = vld [vmem:[#allocation2 + $0x3e0] sm:$0xff] }
  0xfb   : > { %892 = vmatmul.f32.gmra.mxu0 %v2626_v12  ;;  %945 = vmatmul.f32.gmra.mxu1 %v2619_v51 }
  0xfc   : > { %998 = vmatmul.f32.gmra.mxu2 %v2621_v20  ;;  %v2674_v49 = vmax.f32 %v437_v34, 0.0  ;;  %v2689_v34 = vmax.f32 %v440_v38, 0.0 }
  0xfd   : > { %v533_v1 = vpop.f32.mrf.mxu3  ;;  %1236 = vmatpush.msra.mxu2 %v769_v25 }
  0xfe   : > { %v534_v14 = vadd.f32 %v533_v1, %v2624_v33  ;;  %v490_v1 = vadd.f32 %v489_v57, %v2537_v21  ;;  %v709_v57 = vld [vmem:[#allocation2 + $0x200] sm:$0xff] }
  0xff   : > { %1175 = vmatpush.msra.mxu1 %v709_v57 }
 0x100   : > { %v2637_v2 = vmax.f32 %v534_v14, 0.0  ;;  %v495_v14 = vpop.f32.mrf.mxu2 }
 0x101   : > { %1176 = vmatpush.msra.mxu1 %v706_v41  ;;  %v496_v57 = vadd.f32 %v495_v14, %v2537_v21  ;;  %v445_v41 = vpop.f32.mrf.mxu1 }
 0x102   : > { %1051 = vmatmul.f32.vlgmr.msra.gmra.mxu3 %v2637_v2  ;;  %v446_v14 = vadd.f32 %v445_v41, %v2495_v39  ;;  %v808_v41 = vld [vmem:[#allocation2 + $0x518] sm:$0xff] }
 0x103   : > { %895 = vmatmul.f32.gmra.mxu0 %v2643_v29  ;;  %948 = vmatmul.f32.gmra.mxu1 %v2639_v26 }
 0x104   : > { %1001 = vmatmul.f32.gmra.mxu2 %v2641_v0  ;;  %1177 = vmatpush.msra.mxu1 %v703_v48  ;;  %v2706_v48 = vmax.f32 %v496_v57, 0.0 }
 0x105   : > { %v536_v35 = vpop.f32.mrf.mxu3 }
 0x106   : > { %v537_v42 = vadd.f32 %v536_v35, %v2624_v33  ;;  %v2676_v35 = vmax.f32 %v490_v1, 0.0  ;;  %v766_v1 = vld [vmem:[#allocation2 + $0x3c8] sm:$0xff]  ;;  %1178 = vmatpush.msra.mxu1 %v700_v17  ;;  %v811_v17 = vld [vmem:[#allocation2 + $0x530] sm:$0xff] }
 0x107   : > { %1237 = vmatpush.msra.mxu2 %v766_v1  ;;  %1303 = vmatpush.msrb.mxu3 %v811_v17 }
 0x108   : > { %v2655_v32 = vmax.f32 %v537_v42, 0.0  ;;  %v493_v42 = vadd.f32 %v492_v31, %v2537_v21  ;;  %v697_v31 = vld [vmem:[#allocation2 + $0x1a0] sm:$0xff] }
 0x109   : > { %1179 = vmatpush.msra.mxu1 %v697_v31  ;;  %1304 = vmatpush.msrb.mxu3 %v808_v41 }
 0x10a   : > { %1054 = vmatmul.f32.gmra.mxu3 %v2655_v32  ;;  %v2691_v3 = vmax.f32 %v493_v42, 0.0  ;;  %v763_v42 = vld [vmem:[#allocation2 + $0x3b0] sm:$0xff] }
 0x10b   : > { %898 = vmatmul.f32.gmra.mxu0 %v2661_v53  ;;  %951 = vmatmul.f32.gmra.mxu1 %v2657_v10 }
 0x10c   : > { %1004 = vmatmul.f32.gmra.mxu2 %v2659_v50 }
 0x10d   : > { %v539_v60 = vpop.f32.mrf.mxu3  ;;  %1238 = vmatpush.msra.mxu2 %v763_v42  ;;  %v448_v42 = vpop.f32.mrf.mxu1 }
 0x10e   : > { %v540_v9 = vadd.f32 %v539_v60, %v2624_v33  ;;  %v498_v60 = vpop.f32.mrf.mxu2 }
 0x10f   : > { %v499_v31 = vadd.f32 %v498_v60, %v2537_v21  ;;  %v449_v60 = vadd.f32 %v448_v42, %v2495_v39  ;;  %v805_v39 = vld [vmem:[#allocation2 + $0x500] sm:$0xff]  ;;  %v754_v42 = vld [vmem:[#allocation2 + $0x368] sm:$0xff] }
 0x110   : > { %v2672_v52 = vmax.f32 %v540_v9, 0.0  ;;  %v694_v9 = vld [vmem:[#allocation2 + $0x188] sm:$0xff]  ;;  %1305 = vmatpush.msrb.mxu3 %v805_v39 }
 0x111   : > { %1180 = vmatpush.msra.mxu1 %v694_v9  ;;  %v2721_v57 = vmax.f32 %v499_v31, 0.0 }
 0x112   : > { %1057 = vmatmul.f32.gmra.mxu3 %v2672_v52 }
 0x113   : > { %901 = vmatmul.f32.gmra.mxu0 %v2678_v23  ;;  %954 = vmatmul.f32.gmra.mxu1 %v2674_v49 }
 0x114   : > { %1007 = vmatmul.f32.gmra.mxu2 %v2676_v35 }
 0x115   : > { %v542_v16 = vpop.f32.mrf.mxu3 }
 0x116   : > { %v543_v4 = vadd.f32 %v542_v16, %v2624_v33  ;;  %v2704_v16 = vmax.f32 %v443_v24, 0.0  ;;  %v501_v45 = vpop.f32.mrf.mxu2  ;;  %v2719_v24 = vmax.f32 %v446_v14, 0.0 }
 0x118   : > { %v2687_v30 = vmax.f32 %v543_v4, 0.0  ;;  %v2693_v58 = vpop.f32.mrf.mxu0  ;;  %3545 = vst [vmem:[#allocation32_spill] sm:$0xff] %v2719_v24 }
 0x11a   : > { %1060 = vmatmul.f32.gmra.mxu3 %v2687_v30 }
 0x11b   : > { %957 = vmatmul.f32.gmra.mxu1 %v2689_v34  ;;  %1116 = vmatmul.f32.vlgmr.msra.gmra.mxu0 %v2472_v5 }
 0x11c   : > { %1010 = vmatmul.f32.gmra.mxu2 %v2691_v3 }
 0x11d   : > { %v545_v25 = vpop.f32.mrf.mxu3 }
 0x11e   : > { %v546_v59 = vadd.f32 %v545_v25, %v2624_v33  ;;  %v760_v25 = vld [vmem:[#allocation2 + $0x398] sm:$0xff]  ;;  %v504_v17 = vpop.f32.mrf.mxu2 }
 0x11f   : > { %1239 = vmatpush.msra.mxu2 %v760_v25  ;;  %v2734_v25 = vmax.f32 %v449_v60, 0.0  ;;  %v505_v60 = vadd.f32 %v504_v17, %v2537_v21  ;;  %v802_v17 = vld [vmem:[#allocation2 + $0x4e8] sm:$0xff] }
 0x120   : > { %v2702_v38 = vmax.f32 %v546_v59, 0.0  ;;  %v2708_v4 = vpop.f32.mrf.mxu0  ;;  %1306 = vmatpush.msrb.mxu3 %v802_v17 }
 0x121   : > { %3547 = vst [vmem:[#allocation34_spill] sm:$0xff] %v2734_v25  ;;  %v2748_v39 = vmax.f32 %v505_v60, 0.0 }
 0x122   : > { %1063 = vmatmul.f32.gmra.mxu3 %v2702_v38 }
 0x123   : > { %960 = vmatmul.f32.gmra.mxu1 %v2704_v16  ;;  %1119 = vmatmul.f32.gmra.mxu0 %v2478_v22  ;;  %3550 = vst [vmem:[#allocation37_spill] sm:$0xff] %v2748_v39 }
 0x124   : > { %1013 = vmatmul.f32.gmra.mxu2 %v2706_v48 }
 0x125   : > { %v548_v1 = vpop.f32.mrf.mxu3 }
 0x126   : > { %v549_v7 = vadd.f32 %v548_v1, %v2624_v33  ;;  %v502_v1 = vadd.f32 %v501_v45, %v2537_v21 }
 0x128   : > { %v2717_v9 = vmax.f32 %v549_v7, 0.0  ;;  %v2723_v59 = vpop.f32.mrf.mxu0  ;;  %v2736_v41 = vmax.f32 %v502_v1, 0.0 }
 0x12a   : > { %3544 = vst [vmem:[#allocation31_spill] sm:$0xff] %v2717_v9  ;;  %1066 = vmatmul.f32.gmra.mxu3 %v2717_v9  ;;  %v757_v9 = vld [vmem:[#allocation2 + $0x380] sm:$0xff] }
 0x12b   : > { %963 = vmatmul.f32.gmra.mxu1 %v2719_v24  ;;  %1122 = vmatmul.f32.gmra.mxu0 %v2484_v28  ;;  %3548 = vst [vmem:[#allocation35_spill] sm:$0xff] %v2736_v41 }
 0x12c   : > { %1016 = vmatmul.f32.gmra.mxu2 %v2721_v57 }
 0x12d   : > { %v551_v14 = vpop.f32.mrf.mxu3  ;;  %1240 = vmatpush.msra.mxu2 %v757_v9  ;;  %v748_v9 = vld [vmem:[#allocation2 + $0x338] sm:$0xff] }
 0x12e   : > { %v552_v31 = vadd.f32 %v551_v14, %v2624_v33  ;;  %v751_v14 = vld [vmem:[#allocation2 + $0x350] sm:$0xff] }
 0x12f   : > { %1241 = vmatpush.msra.mxu2 %v754_v42 }
 0x130   : > { %v2732_v7 = vmax.f32 %v552_v31, 0.0  ;;  %v2738_v24 = vpop.f32.mrf.mxu0  ;;  %v507_v31 = vpop.f32.mrf.mxu2 }
 0x131   : > { %1242 = vmatpush.msra.mxu2 %v751_v14  ;;  %v508_v60 = vadd.f32 %v507_v31, %v2537_v21 }
 0x132   : > { %3546 = vst [vmem:[#allocation33_spill] sm:$0xff] %v2732_v7  ;;  %1069 = vmatmul.f32.gmra.mxu3 %v2732_v7 }
 0x133   : > { %966 = vmatmul.f32.gmra.mxu1 %v2734_v25  ;;  %1125 = vmatmul.f32.gmra.mxu0 %v2490_v37  ;;  %v745_v37 = vld [vmem:[#allocation2 + $0x320] sm:$0xff] }
 0x134   : > { %1019 = vmatmul.f32.gmra.mxu2 %v2736_v41  ;;  %v742_v41 = vld [vmem:[#allocation2 + $0x308] sm:$0xff] }
 0x135   : > { %v554_v45 = vpop.f32.mrf.mxu3  ;;  %1243 = vmatpush.msra.mxu2 %v748_v9 }
 0x136   : > { %v555_v1 = vadd.f32 %v554_v45, %v2624_v33 }
 0x137   : > { %1244 = vmatpush.msra.mxu2 %v745_v37 }
 0x138   : > { %v2746_v7 = vmax.f32 %v555_v1, 0.0  ;;  %v2750_v42 = vpop.f32.mrf.mxu0  ;;  %v2752_v25 = vpop.f32.mrf.mxu1 }
 0x139   : > { %1245 = vmatpush.msra.mxu2 %v742_v41  ;;  %v510_v9 = vpop.f32.mrf.mxu2 }
 0x13a   : > { %3549 = vst [vmem:[#allocation36_spill] sm:$0xff] %v2746_v7  ;;  %1072 = vmatmul.f32.gmra.mxu3 %v2746_v7  ;;  %v2762_v7 = vmax.f32 %v508_v60, 0.0  ;;  %v511_v31 = vadd.f32 %v510_v9, %v2537_v21 }
 0x13b   : > { %1128 = vmatmul.f32.gmra.mxu0 %v2500_v46  ;;  %1181 = vmatmul.f32.vlgmr.msra.gmra.mxu1 %v2502_v47  ;;  %v799_v47 = vld [vmem:[#allocation2 + $0x4d0] sm:$0xff] }
 0x13c   : > { %1022 = vmatmul.f32.gmra.mxu2 %v2748_v39  ;;  %3552 = vst [vmem:[#allocation39_spill] sm:$0xff] %v2762_v7  ;;  %1307 = vmatpush.msrb.mxu3 %v799_v47 }
 0x13d   : > { %v557_v45 = vpop.f32.mrf.mxu3 }
 0x13e   : > { %v558_v14 = vadd.f32 %v557_v45, %v2624_v33 }
 0x140   : > { %v2760_v1 = vmax.f32 %v558_v14, 0.0  ;;  %v2764_v37 = vpop.f32.mrf.mxu0  ;;  %v2766_v17 = vpop.f32.mrf.mxu1  ;;  %v2776_v14 = vmax.f32 %v511_v31, 0.0 }
 0x141   : > { %v513_v47 = vpop.f32.mrf.mxu2 }
 0x142   : > { %3551 = vst [vmem:[#allocation38_spill] sm:$0xff] %v2760_v1  ;;  %1075 = vmatmul.f32.gmra.mxu3 %v2760_v1 }
 0x143   : > { %1131 = vmatmul.f32.gmra.mxu0 %v2510_v54  ;;  %1184 = vmatmul.f32.gmra.mxu1 %v2512_v55  ;;  %3554 = vst [vmem:[#allocation41_spill] sm:$0xff] %v2776_v14  ;;  %v796_v54 = vld [vmem:[#allocation2 + $0x4b8] sm:$0xff] }
 0x144   : > { %1025 = vmatmul.f32.gmra.mxu2 %v2762_v7  ;;  %1308 = vmatpush.msrb.mxu3 %v796_v54  ;;  %v793_v54 = vld [vmem:[#allocation2 + $0x4a0] sm:$0xff] }
 0x145   : > { %v560_v41 = vpop.f32.mrf.mxu3 }
 0x146   : > { %v561_v45 = vadd.f32 %v560_v41, %v2624_v33  ;;  %v514_v41 = vadd.f32 %v513_v47, %v2537_v21  ;;  %1309 = vmatpush.msrb.mxu3 %v793_v54 }
 0x148   : > { %v2774_v60 = vmax.f32 %v561_v45, 0.0  ;;  %v2778_v39 = vpop.f32.mrf.mxu0  ;;  %v2780_v1 = vpop.f32.mrf.mxu1  ;;  %v2790_v7 = vmax.f32 %v514_v41, 0.0 }
 0x14a   : > { %3553 = vst [vmem:[#allocation40_spill] sm:$0xff] %v2774_v60  ;;  %1078 = vmatmul.f32.gmra.mxu3 %v2774_v60 }
 0x14b   : > { %1134 = vmatmul.f32.gmra.mxu0 %v2520_v62  ;;  %1187 = vmatmul.f32.gmra.mxu1 %v2522_v63  ;;  %3556 = vst [vmem:[#allocation43_spill] sm:$0xff] %v2790_v7 }
 0x14c   : > { %1028 = vmatmul.f32.gmra.mxu2 %v2776_v14  ;;  %v686_v14 = vld [vmem:[#allocation2 + $0x148] sm:$0xff] }
 0x14d   : > { %v563_v9 = vpop.f32.mrf.mxu3 }
 0x14e   : > { %v564_v31 = vadd.f32 %v563_v9, %v2624_v33 }
 0x150   : > { %v2788_v45 = vmax.f32 %v564_v31, 0.0  ;;  %v2792_v55 = vpop.f32.mrf.mxu0  ;;  %v2794_v60 = vpop.f32.mrf.mxu1 }
 0x152   : > { %3555 = vst [vmem:[#allocation42_spill] sm:$0xff] %v2788_v45  ;;  %1081 = vmatmul.f32.gmra.mxu3 %v2788_v45  ;;  %v790_v45 = vld [vmem:[#allocation2 + $0x488] sm:$0xff] }
 0x153   : > { %1137 = vmatmul.f32.gmra.mxu0 %v2530_v18  ;;  %1190 = vmatmul.f32.gmra.mxu1 %v2532_v19 }
 0x154   : > { %1031 = vmatmul.f32.gmra.mxu2 %v2790_v7  ;;  %1310 = vmatpush.msrb.mxu3 %v790_v45  ;;  %v692_v7 = vld [vmem:[#allocation2 + $0x178] sm:$0xff] }
 0x155   : > { %v566_v21 = vpop.f32.mrf.mxu3  ;;  %1360 = vmatpush.msrb.mxu0 %v692_v7  ;;  %v788_v45 = vld [vmem:[#allocation2 + $0x478] sm:$0xff] }
 0x156   : > { %v567_v47 = vadd.f32 %v566_v21, %v2624_v33  ;;  %1490 = vmatpush.msrb.mxu2 %v788_v45  ;;  %v677_v45 = vld [vmem:[#allocation2 + $0x100] sm:$0xff] }
 0x158   : > { %v2801_v9 = vmax.f32 %v567_v47, 0.0  ;;  %v2803_v41 = vpop.f32.mrf.mxu0  ;;  %v2805_v31 = vpop.f32.mrf.mxu1  ;;  %v689_v47 = vld [vmem:[#allocation2 + $0x160] sm:$0xff] }
 0x159   : > { %1361 = vmatpush.msrb.mxu0 %v689_v47 }
 0x15a   : > { %3557 = vst [vmem:[#allocation44_spill] sm:$0xff] %v2801_v9  ;;  %1084 = vmatmul.f32.gmra.mxu3 %v2801_v9 }
 0x15b   : > { %1140 = vmatmul.f32.gmra.mxu0 %v2548_v11  ;;  %1193 = vmatmul.f32.gmra.mxu1 %v2545_v27  ;;  %v836_v27 = vld [vmem:[#allocation2 + $0x5f8] sm:$0xff] }
 0x15c   : > { %1246 = vmatmul.f32.vlgmr.msra.gmra.mxu2 %v2550_v6  ;;  %v683_v6 = vld [vmem:[#allocation2 + $0x130] sm:$0xff]  ;;  %1362 = vmatpush.msrb.mxu0 %v686_v14  ;;  %v785_v14 = vld [vmem:[#allocation2 + $0x460] sm:$0xff] }
 0x15d   : > { %v569_v54 = vpop.f32.mrf.mxu3  ;;  %1555 = vmatpush.msra.mxu3 %v836_v27  ;;  %1491 = vmatpush.msrb.mxu2 %v785_v14  ;;  %v665_v14 = vld [vmem:[#allocation2 + $0xa0] sm:$0xff] }
 0x15e   : > { %v570_v21 = vadd.f32 %v569_v54, %v2624_v33  ;;  %1363 = vmatpush.msrb.mxu0 %v683_v6  ;;  %v740_v54 = vld [vmem:[#allocation2 + $0x2f8] sm:$0xff]  ;;  %v833_v6 = vld [vmem:[#allocation2 + $0x5e0] sm:$0xff] }
 0x15f   : > { %v2814_v18 = vpop.f32.mrf.mxu2  ;;  %1425 = vmatpush.msrb.mxu1 %v740_v54  ;;  %1556 = vmatpush.msra.mxu3 %v833_v6 }
 0x160   : > { %v2812_v19 = vmax.f32 %v570_v21, 0.0  ;;  %v2816_v9 = vpop.f32.mrf.mxu1  ;;  %v2819_v11 = vpop.f32.mrf.mxu0  ;;  %v680_v21 = vld [vmem:[#allocation2 + $0x118] sm:$0xff] }
 0x161   : > { %1364 = vmatpush.msrb.mxu0 %v680_v21  ;;  %v737_v21 = vld [vmem:[#allocation2 + $0x2e0] sm:$0xff] }
 0x162   : > { %3558 = vst [vmem:[#allocation45_spill] sm:$0xff] %v2812_v19  ;;  %1087 = vmatmul.f32.gmra.mxu3 %v2812_v19  ;;  %1426 = vmatpush.msrb.mxu1 %v737_v21  ;;  %v734_v21 = vld [vmem:[#allocation2 + $0x2c8] sm:$0xff] }
 0x163   : > { %1143 = vmatmul.f32.gmra.mxu0 %v2566_v43  ;;  %1196 = vmatmul.f32.gmra.mxu1 %v2563_v40  ;;  %v674_v40 = vld [vmem:[#allocation2 + $0xe8] sm:$0xff] }
 0x164   : > { %1249 = vmatmul.f32.gmra.mxu2 %v2568_v44  ;;  %1365 = vmatpush.msrb.mxu0 %v677_v45  ;;  %v671_v44 = vld [vmem:[#allocation2 + $0xd0] sm:$0xff] }
 0x165   : > { %v572_v7 = vpop.f32.mrf.mxu3  ;;  %1427 = vmatpush.msrb.mxu1 %v734_v21  ;;  %v731_v21 = vld [vmem:[#allocation2 + $0x2b0] sm:$0xff] }
 0x166   : > { %v573_v47 = vadd.f32 %v572_v7, %v2624_v33  ;;  %1366 = vmatpush.msrb.mxu0 %v674_v40 }
 0x167   : > { %v2827_v63 = vpop.f32.mrf.mxu2  ;;  %1428 = vmatpush.msrb.mxu1 %v731_v21  ;;  %v728_v21 = vld [vmem:[#allocation2 + $0x298] sm:$0xff] }
 0x168   : > { %v2825_v19 = vmax.f32 %v573_v47, 0.0  ;;  %v2829_v27 = vpop.f32.mrf.mxu1  ;;  %v2834_v7 = vpop.f32.mrf.mxu0  ;;  %1367 = vmatpush.msrb.mxu0 %v671_v44  ;;  %v668_v47 = vld [vmem:[#allocation2 + $0xb8] sm:$0xff]  ;;  %v830_v44 = vld [vmem:[#allocation2 + $0x5c8] sm:$0xff] }
 0x169   : > { %1557 = vmatpush.msra.mxu3 %v830_v44  ;;  %1429 = vmatpush.msrb.mxu1 %v728_v21  ;;  %v713_v21 = vld [vmem:[#allocation2 + $0x220] sm:$0xff] }
 0x16a   : > { %3559 = vst [vmem:[#allocation46_spill] sm:$0xff] %v2825_v19  ;;  %1090 = vmatmul.f32.gmra.mxu3 %v2825_v19  ;;  %1368 = vmatpush.msrb.mxu0 %v668_v47  ;;  %v656_v47 = vld [vmem:[#allocation2 + $0x58] sm:$0xff] }
 0x16b   : > { %1146 = vmatmul.f32.gmra.mxu0 %v2584_v61  ;;  %1199 = vmatmul.f32.gmra.mxu1 %v2581_v56  ;;  %v782_v56 = vld [vmem:[#allocation2 + $0x448] sm:$0xff] }
 0x16c   : > { %1252 = vmatmul.f32.gmra.mxu2 %v2586_v13  ;;  %1369 = vmatpush.msrb.mxu0 %v665_v14  ;;  %v662_v61 = vld [vmem:[#allocation2 + $0x88] sm:$0xff]  ;;  %v659_v13 = vld [vmem:[#allocation2 + $0x70] sm:$0xff] }
 0x16d   : > { %v575_v54 = vpop.f32.mrf.mxu3  ;;  %1492 = vmatpush.msrb.mxu2 %v782_v56  ;;  %v653_v56 = vld [vmem:[#allocation2 + $0x40] sm:$0xff] }
 0x16e   : > { %v576_v45 = vadd.f32 %v575_v54, %v2624_v33  ;;  %1370 = vmatpush.msrb.mxu0 %v662_v61 }
 0x16f   : > { %v2840_v40 = vpop.f32.mrf.mxu2 }
 0x170   : > { %v2838_v19 = vmax.f32 %v576_v45, 0.0  ;;  %v2842_v6 = vpop.f32.mrf.mxu1  ;;  %1371 = vmatpush.msrb.mxu0 %v659_v13  ;;  %v2849_v14 = vpop.f32.mrf.mxu0  ;;  %v827_v13 = vld [vmem:[#allocation2 + $0x5b0] sm:$0xff] }
 0x171   : > { %1558 = vmatpush.msra.mxu3 %v827_v13 }
 0x172   : > { %3560 = vst [vmem:[#allocation47_spill] sm:$0xff] %v2838_v19  ;;  %1093 = vmatmul.f32.gmra.mxu3 %v2838_v19  ;;  %1372 = vmatpush.msrb.mxu0 %v656_v47 }
 0x173   : > { %1149 = vmatmul.f32.gmra.mxu0 %v2603_v36  ;;  %1202 = vmatmul.f32.gmra.mxu1 %v2598_v15  ;;  %v779_v15 = vld [vmem:[#allocation2 + $0x430] sm:$0xff] }
 0x174   : > { %1255 = vmatmul.f32.gmra.mxu2 %v2605_v8  ;;  %1373 = vmatpush.msrb.mxu0 %v653_v56  ;;  %v650_v8 = vld [vmem:[#allocation2 + $0x28] sm:$0xff]  ;;  %v647_v36 = vld [vmem:[#allocation2 + $0x10] sm:$0xff]  ;;  %v776_v56 = vld [vmem:[#allocation2 + $0x418] sm:$0xff] }
 0x175   : > { %v578_v54 = vpop.f32.mrf.mxu3  ;;  %1493 = vmatpush.msrb.mxu2 %v779_v15 }
 0x176   : > { %v579_v45 = vadd.f32 %v578_v54, %v2624_v33  ;;  %1374 = vmatpush.msrb.mxu0 %v650_v8  ;;  %v2125_v33 = vld [vmem:[%s3458_s1] sm:$0xff] }
 0x177   : > { %v2853_v61 = vpop.f32.mrf.mxu2  ;;  %v2861_v54 = vperm.slane %v2125_v33, 5  ;;  %1494 = vmatpush.msrb.mxu2 %v776_v56  ;;  %v824_v33 = vld [vmem:[#allocation2 + $0x598] sm:$0xff] }
 0x178   : > { %v2851_v19 = vmax.f32 %v579_v45, 0.0  ;;  %v2855_v44 = vpop.f32.mrf.mxu1  ;;  %1375 = vmatpush.msrb.mxu0 %v647_v36  ;;  %v2870_v47 = vpop.f32.mrf.mxu0  ;;  %1559 = vmatpush.msra.mxu3 %v824_v33 }
 0x179   : > { %v858_v15 = vadd.f32 %v2693_v58, %v2861_v54 }
 0x17a   : > { %1096 = vmatmul.f32.gmra.mxu3 %v2851_v19 }
 0x17b   : > { %1152 = vmatmul.f32.gmra.mxu0 %v2626_v12  ;;  %1205 = vmatmul.f32.gmra.mxu1 %v2619_v51  ;;  %v923_v13 = vadd.f32 %v2752_v25, %v858_v15  ;;  %v725_v25 = vld [vmem:[#allocation2 + $0x280] sm:$0xff] }
 0x17c   : > { %1258 = vmatmul.f32.gmra.mxu2 %v2621_v20  ;;  %v861_v20 = vadd.f32 %v2708_v4, %v2861_v54  ;;  %1430 = vmatpush.msrb.mxu1 %v725_v25 }
 0x17d   : > { %v988_v36 = vadd.f32 %v2814_v18, %v923_v13  ;;  %v773_v18 = vld [vmem:[#allocation2 + $0x400] sm:$0xff]  ;;  %v722_v13 = vld [vmem:[#allocation2 + $0x268] sm:$0xff] }
 0x17e   : > { %v926_v33 = vadd.f32 %v2766_v17, %v861_v20  ;;  %1495 = vmatpush.msrb.mxu2 %v773_v18  ;;  %1431 = vmatpush.msrb.mxu1 %v722_v13  ;;  %v716_v20 = vld [vmem:[#allocation2 + $0x238] sm:$0xff]  ;;  %v864_v17 = vadd.f32 %v2723_v59, %v2861_v54  ;;  %v710_v18 = vld [vmem:[#allocation2 + $0x208] sm:$0xff] }
 0x17f   : > { %v2868_v8 = vpop.f32.mrf.mxu2 }
 0x180   : > { %v2872_v45 = vpop.f32.mrf.mxu1  ;;  %v991_v4 = vadd.f32 %v2827_v63, %v926_v33  ;;  %v770_v63 = vld [vmem:[#allocation2 + $0x3e8] sm:$0xff]  ;;  %v929_v13 = vadd.f32 %v2780_v1, %v864_v17  ;;  %v707_v33 = vld [vmem:[#allocation2 + $0x1f0] sm:$0xff]  ;;  %v704_v1 = vld [vmem:[#allocation2 + $0x1d8] sm:$0xff] }
 0x181   : > { %1496 = vmatpush.msrb.mxu2 %v770_v63 }
 0x182   : > { %1311 = vmatmul.f32.vlgmr.msrb.gmra.mxu3 %v2637_v2  ;;  %v994_v59 = vadd.f32 %v2840_v40, %v929_v13  ;;  %v698_v13 = vld [vmem:[#allocation2 + $0x1a8] sm:$0xff] }
 0x183   : > { %1155 = vmatmul.f32.gmra.mxu0 %v2643_v29  ;;  %1208 = vmatmul.f32.gmra.mxu1 %v2639_v26  ;;  %v719_v26 = vld [vmem:[#allocation2 + $0x250] sm:$0xff]  ;;  %v2890_v29 = vpop.f32.mrf.mxu0 }
 0x184   : > { %1261 = vmatmul.f32.gmra.mxu2 %v2641_v0  ;;  %v821_v0 = vld [vmem:[#allocation2 + $0x580] sm:$0xff]  ;;  %1432 = vmatpush.msrb.mxu1 %v719_v26  ;;  %v818_v26 = vld [vmem:[#allocation2 + $0x568] sm:$0xff] }
 0x185   : > { %v1052_v58 = vpop.f32.mrf.mxu3  ;;  %1560 = vmatpush.msra.mxu3 %v821_v0 }
 0x186   : > { %v2882_v51 = vadd.f32 %v1052_v58, %v988_v36  ;;  %1433 = vmatpush.msrb.mxu1 %v716_v20  ;;  %v867_v20 = vadd.f32 %v2738_v24, %v2861_v54 }
 0x187   : > { %v2884_v15 = vpop.f32.mrf.mxu2  ;;  %1561 = vmatpush.msra.mxu3 %v818_v26 }
 0x188   : > { %v2886_v56 = vpop.f32.mrf.mxu1  ;;  %1434 = vmatpush.msrb.mxu1 %v713_v21  ;;  %v701_v21 = vld [vmem:[#allocation2 + $0x1c0] sm:$0xff]  ;;  %v932_v26 = vadd.f32 %v2794_v60, %v867_v20 }
 0x18a   : > { %1314 = vmatmul.f32.gmra.mxu3 %v2655_v32  ;;  %1435 = vmatpush.msrb.mxu1 %v710_v18  ;;  %v767_v18 = vld [vmem:[#allocation2 + $0x3d0] sm:$0xff]  ;;  %v997_v24 = vadd.f32 %v2853_v61, %v932_v26  ;;  %v764_v61 = vld [vmem:[#allocation2 + $0x3b8] sm:$0xff]  ;;  %v873_v26 = vadd.f32 %v2764_v37, %v2861_v54 }
 0x18b   : > { %1158 = vmatmul.f32.gmra.mxu0 %v2661_v53  ;;  %1211 = vmatmul.f32.gmra.mxu1 %v2657_v10 }
 0x18c   : > { %1264 = vmatmul.f32.gmra.mxu2 %v2659_v50  ;;  %1436 = vmatpush.msrb.mxu1 %v707_v33  ;;  %v815_v33 = vld [vmem:[#allocation2 + $0x550] sm:$0xff] }
 0x18d   : > { %v1055_v36 = vpop.f32.mrf.mxu3  ;;  %1497 = vmatpush.msrb.mxu2 %v767_v18  ;;  %1562 = vmatpush.msra.mxu3 %v815_v33 }
 0x18e   : > { %v2898_v58 = vadd.f32 %v1055_v36, %v991_v4  ;;  %v2909_v4 = vpop.f32.mrf.mxu0  ;;  %1437 = vmatpush.msrb.mxu1 %v704_v1  ;;  %v870_v1 = vadd.f32 %v2750_v42, %v2861_v54 }
 0x18f   : > { %v2900_v25 = vpop.f32.mrf.mxu2  ;;  %1498 = vmatpush.msrb.mxu2 %v764_v61 }
 0x190   : > { %3561 = vst [vmem:[#allocation48_spill] sm:$0xff] %v2898_v58  ;;  %v2902_v0 = vpop.f32.mrf.mxu1  ;;  %1438 = vmatpush.msrb.mxu1 %v701_v21  ;;  %v695_v58 = vld [vmem:[#allocation2 + $0x190] sm:$0xff]  ;;  %v935_v18 = vadd.f32 %v2805_v31, %v870_v1  ;;  %v3565_v1 = vld [vmem:[#allocation31_spill] sm:$0xff] }
 0x192   : > { %1317 = vmatmul.f32.gmra.mxu3 %v2672_v52  ;;  %1439 = vmatpush.msrb.mxu1 %v698_v13 }
 0x193   : > { %1161 = vmatmul.f32.gmra.mxu0 %v2678_v23  ;;  %1214 = vmatmul.f32.gmra.mxu1 %v2674_v49 }
 0x194   : > { %1267 = vmatmul.f32.gmra.mxu2 %v2676_v35  ;;  %1440 = vmatpush.msrb.mxu1 %v695_v58  ;;  %v1000_v58 = vadd.f32 %v2868_v8, %v935_v18  ;;  %v938_v8 = vadd.f32 %v2816_v9, %v873_v26  ;;  %v3566_v18 = vld [vmem:[#allocation32_spill] sm:$0xff]  ;;  %v758_v26 = vld [vmem:[#allocation2 + $0x388] sm:$0xff] }
 0x195   : > { %v1058_v36 = vpop.f32.mrf.mxu3 }
 0x196   : > { %v2914_v17 = vadd.f32 %v1058_v36, %v994_v59  ;;  %v2928_v60 = vpop.f32.mrf.mxu0  ;;  %v1003_v61 = vadd.f32 %v2884_v15, %v938_v8  ;;  %v3568_v15 = vld [vmem:[#allocation33_spill] sm:$0xff] }
 0x197   : > { %v2916_v63 = vpop.f32.mrf.mxu2  ;;  %v806_v8 = vld [vmem:[#allocation2 + $0x508] sm:$0xff] }
 0x198   : > { %v2918_v40 = vpop.f32.mrf.mxu1 }
 0x19a   : > { %1320 = vmatmul.f32.gmra.mxu3 %v2687_v30 }
 0x19b   : > { %1217 = vmatmul.f32.gmra.mxu1 %v2689_v34  ;;  %1376 = vmatmul.f32.vlgmr.msrb.gmra.mxu0 %v2472_v5  ;;  %v812_v5 = vld [vmem:[#allocation2 + $0x538] sm:$0xff] }
 0x19c   : > { %1270 = vmatmul.f32.gmra.mxu2 %v2691_v3  ;;  %1563 = vmatpush.msra.mxu3 %v812_v5 }
 0x19d   : > { %v1061_v59 = vpop.f32.mrf.mxu3 }
 0x19e   : > { %v2926_v36 = vadd.f32 %v1061_v59, %v997_v24  ;;  %v2948_v33 = vpop.f32.mrf.mxu0  ;;  %v761_v59 = vld [vmem:[#allocation2 + $0x3a0] sm:$0xff] }
 0x19f   : > { %v2932_v20 = vpop.f32.mrf.mxu2  ;;  %3564 = vst [vmem:[#allocation51_spill] sm:$0xff] %v2948_v33  ;;  %1499 = vmatpush.msrb.mxu2 %v761_v59 }
 0x1a0   : > { %3562 = vst [vmem:[#allocation49_spill] sm:$0xff] %v2926_v36  ;;  %v2934_v21 = vpop.f32.mrf.mxu1  ;;  %v752_v36 = vld [vmem:[#allocation2 + $0x358] sm:$0xff] }
 0x1a1   : > { %1500 = vmatpush.msrb.mxu2 %v758_v26 }
 0x1a2   : > { %1323 = vmatmul.f32.gmra.mxu3 %v2702_v38 }
 0x1a3   : > { %1220 = vmatmul.f32.gmra.mxu1 %v2704_v16  ;;  %1379 = vmatmul.f32.gmra.mxu0 %v2478_v22  ;;  %v809_v22 = vld [vmem:[#allocation2 + $0x520] sm:$0xff] }
 0x1a4   : > { %1273 = vmatmul.f32.gmra.mxu2 %v2706_v48  ;;  %1564 = vmatpush.msra.mxu3 %v809_v22  ;;  %v755_v22 = vld [vmem:[#allocation2 + $0x370] sm:$0xff] }
 0x1a5   : > { %v1064_v42 = vpop.f32.mrf.mxu3  ;;  %1501 = vmatpush.msrb.mxu2 %v755_v22  ;;  %v3575_v22 = vld [vmem:[#allocation9_spill] sm:$0xff] }
 0x1a6   : > { %v2942_v13 = vadd.f32 %v1064_v42, %v1000_v58  ;;  %v876_v58 = vadd.f32 %v2778_v39, %v2861_v54  ;;  %1565 = vmatpush.msra.mxu3 %v806_v8  ;;  %v3571_v39 = vld [vmem:[#allocation8_spill] sm:$0xff] }
 0x1a7   : > { %v2946_v31 = vpop.f32.mrf.mxu2  ;;  %1502 = vmatpush.msrb.mxu2 %v752_v36 }
 0x1a8   : > { %3563 = vst [vmem:[#allocation50_spill] sm:$0xff] %v2942_v13  ;;  %v2950_v24 = vpop.f32.mrf.mxu1  ;;  %v941_v59 = vadd.f32 %v2829_v27, %v876_v58  ;;  %v749_v27 = vld [vmem:[#allocation2 + $0x340] sm:$0xff]  ;;  %v879_v58 = vadd.f32 %v2792_v55, %v2861_v54 }
 0x1a9   : > { %1503 = vmatpush.msrb.mxu2 %v749_v27 }
 0x1aa   : > { %1326 = vmatmul.f32.gmra.mxu3 %v3565_v1 }
 0x1ab   : > { %1223 = vmatmul.f32.gmra.mxu1 %v3566_v18  ;;  %1382 = vmatmul.f32.gmra.mxu0 %v2484_v28  ;;  %v2968_v28 = vpop.f32.mrf.mxu0 }
 0x1ac   : > { %1276 = vmatmul.f32.gmra.mxu2 %v2721_v57  ;;  %3569 = vst [vmem:[#allocation32_spill] sm:$0xff] %v2968_v28  ;;  %v746_v28 = vld [vmem:[#allocation2 + $0x328] sm:$0xff] }
 0x1ad   : > { %v1067_v37 = vpop.f32.mrf.mxu3  ;;  %1504 = vmatpush.msrb.mxu2 %v746_v28  ;;  %v3581_v28 = vld [vmem:[#allocation39_spill] sm:$0xff] }
 0x1ae   : > { %v2958_v5 = vadd.f32 %v1067_v37, %v1003_v61  ;;  %v1006_v61 = vadd.f32 %v2900_v25, %v941_v59  ;;  %v3570_v37 = vld [vmem:[#allocation34_spill] sm:$0xff]  ;;  %v944_v25 = vadd.f32 %v2842_v6, %v879_v58  ;;  %v3574_v59 = vld [vmem:[#allocation36_spill] sm:$0xff]  ;;  %v882_v6 = vadd.f32 %v2803_v41, %v2861_v54 }
 0x1af   : > { %v2962_v9 = vpop.f32.mrf.mxu2  ;;  %v3578_v58 = vld [vmem:[#allocation38_spill] sm:$0xff] }
 0x1b0   : > { %3567 = vst [vmem:[#allocation31_spill] sm:$0xff] %v2958_v5  ;;  %v2964_v42 = vpop.f32.mrf.mxu1  ;;  %v3572_v5 = vld [vmem:[#allocation35_spill] sm:$0xff] }
 0x1b2   : > { %1329 = vmatmul.f32.gmra.mxu3 %v3568_v15 }
 0x1b3   : > { %1226 = vmatmul.f32.gmra.mxu1 %v3570_v37  ;;  %1385 = vmatmul.f32.gmra.mxu0 %v3571_v39  ;;  %v803_v39 = vld [vmem:[#allocation2 + $0x4f0] sm:$0xff]  ;;  %v2987_v55 = vpop.f32.mrf.mxu0 }
 0x1b4   : > { %1279 = vmatmul.f32.gmra.mxu2 %v3572_v5  ;;  %1566 = vmatpush.msra.mxu3 %v803_v39 }
 0x1b5   : > { %v1070_v13 = vpop.f32.mrf.mxu3 }
 0x1b6   : > { %v2974_v33 = vadd.f32 %v1070_v13, %v1006_v61  ;;  %v1009_v13 = vadd.f32 %v2916_v63, %v944_v25  ;;  %v3576_v61 = vld [vmem:[#allocation37_spill] sm:$0xff]  ;;  %v800_v25 = vld [vmem:[#allocation2 + $0x4d8] sm:$0xff] }
 0x1b7   : > { %v2978_v26 = vpop.f32.mrf.mxu2  ;;  %1567 = vmatpush.msra.mxu3 %v800_v25  ;;  %v797_v25 = vld [vmem:[#allocation2 + $0x4c0] sm:$0xff] }
 0x1b8   : > { %3573 = vst [vmem:[#allocation33_spill] sm:$0xff] %v2974_v33  ;;  %v2980_v8 = vpop.f32.mrf.mxu1  ;;  %v743_v33 = vld [vmem:[#allocation2 + $0x310] sm:$0xff] }
 0x1b9   : > { %1505 = vmatpush.msrb.mxu2 %v743_v33  ;;  %1568 = vmatpush.msra.mxu3 %v797_v25 }
 0x1ba   : > { %1332 = vmatmul.f32.gmra.mxu3 %v3574_v59 }
 0x1bb   : > { %1388 = vmatmul.f32.gmra.mxu0 %v2500_v46  ;;  %1441 = vmatmul.f32.vlgmr.msrb.gmra.mxu1 %v3575_v22  ;;  %v947_v46 = vadd.f32 %v2855_v44, %v882_v6  ;;  %v3579_v22 = vld [vmem:[#allocation10_spill] sm:$0xff]  ;;  %v3006_v33 = vpop.f32.mrf.mxu0  ;;  %v885_v44 = vadd.f32 %v2819_v11, %v2861_v54 }
 0x1bc   : > { %1282 = vmatmul.f32.gmra.mxu2 %v3576_v61  ;;  %3583 = vst [vmem:[#allocation36_spill] sm:$0xff] %v3006_v33 }
 0x1bd   : > { %v1073_v36 = vpop.f32.mrf.mxu3  ;;  %v1012_v39 = vadd.f32 %v2932_v20, %v947_v46  ;;  %v950_v20 = vadd.f32 %v2872_v45, %v885_v44  ;;  %v3584_v46 = vld [vmem:[#allocation40_spill] sm:$0xff] }
 0x1be   : > { %v2990_v5 = vadd.f32 %v1073_v36, %v1009_v13  ;;  %v3580_v13 = vld [vmem:[#allocation11_spill] sm:$0xff] }
 0x1bf   : > { %v2994_v27 = vpop.f32.mrf.mxu2 }
 0x1c0   : > { %3577 = vst [vmem:[#allocation34_spill] sm:$0xff] %v2990_v5  ;;  %v2996_v63 = vpop.f32.mrf.mxu1 }
 0x1c2   : > { %1335 = vmatmul.f32.gmra.mxu3 %v3578_v58 }
 0x1c3   : > { %1391 = vmatmul.f32.gmra.mxu0 %v3579_v22  ;;  %1444 = vmatmul.f32.gmra.mxu1 %v3580_v13  ;;  %v1015_v22 = vadd.f32 %v2946_v31, %v950_v20  ;;  %v3586_v13 = vld [vmem:[#allocation41_spill] sm:$0xff]  ;;  %v3026_v45 = vpop.f32.mrf.mxu0  ;;  %v3589_v20 = vld [vmem:[#allocation42_spill] sm:$0xff] }
 0x1c4   : > { %1285 = vmatmul.f32.gmra.mxu2 %v3581_v28  ;;  %3588 = vst [vmem:[#allocation37_spill] sm:$0xff] %v3026_v45  ;;  %v891_v45 = vadd.f32 %v2849_v14, %v2861_v54 }
 0x1c5   : > { %v1076_v41 = vpop.f32.mrf.mxu3 }
 0x1c6   : > { %v3004_v36 = vadd.f32 %v1076_v41, %v1012_v39  ;;  %v3585_v39 = vld [vmem:[#allocation12_spill] sm:$0xff] }
 0x1c7   : > { %v3010_v6 = vpop.f32.mrf.mxu2 }
 0x1c8   : > { %3582 = vst [vmem:[#allocation8_spill] sm:$0xff] %v3004_v36  ;;  %v3012_v5 = vpop.f32.mrf.mxu1  ;;  %v888_v36 = vadd.f32 %v2834_v7, %v2861_v54 }
 0x1ca   : > { %1338 = vmatmul.f32.gmra.mxu3 %v3584_v46  ;;  %v953_v31 = vadd.f32 %v2886_v56, %v888_v36  ;;  %v956_v36 = vadd.f32 %v2902_v0, %v891_v45  ;;  %v1682_v0 = vld [vmem:[#allocation4 + $0x70] sm:$0xff]  ;;  %v894_v45 = vadd.f32 %v2870_v47, %v2861_v54  ;;  %v3601_v47 = vld [vmem:[#allocation19_spill] sm:$0xff] }
 0x1cb   : > { %1394 = vmatmul.f32.gmra.mxu0 %v2520_v62  ;;  %1447 = vmatmul.f32.gmra.mxu1 %v3585_v39  ;;  %v794_v62 = vld [vmem:[#allocation2 + $0x4a8] sm:$0xff] }
 0x1cc   : > { %1288 = vmatmul.f32.gmra.mxu2 %v3586_v13  ;;  %1569 = vmatpush.msra.mxu3 %v794_v62  ;;  %v1018_v25 = vadd.f32 %v2962_v9, %v953_v31  ;;  %v3590_v39 = vld [vmem:[#allocation13_spill] sm:$0xff]  ;;  %v3594_v62 = vld [vmem:[#allocation44_spill] sm:$0xff]  ;;  %v791_v9 = vld [vmem:[#allocation2 + $0x490] sm:$0xff]  ;;  %v3046_v31 = vpop.f32.mrf.mxu0 }
 0x1cd   : > { %v1079_v41 = vpop.f32.mrf.mxu3 }
 0x1ce   : > { %v3020_v11 = vadd.f32 %v1079_v41, %v1015_v22  ;;  %v3591_v22 = vld [vmem:[#allocation14_spill] sm:$0xff]  ;;  %v3592_v41 = vld [vmem:[#allocation43_spill] sm:$0xff]  ;;  %1570 = vmatpush.msra.mxu3 %v791_v9 }
 0x1cf   : > { %v3024_v33 = vpop.f32.mrf.mxu2 }
 0x1d0   : > { %3587 = vst [vmem:[#allocation9_spill] sm:$0xff] %v3020_v11  ;;  %v3028_v44 = vpop.f32.mrf.mxu1 }
 0x1d2   : > { %1341 = vmatmul.f32.gmra.mxu3 %v3589_v20 }
 0x1d3   : > { %1397 = vmatmul.f32.gmra.mxu0 %v3590_v39  ;;  %1450 = vmatmul.f32.gmra.mxu1 %v3591_v22  ;;  %v1021_v39 = vadd.f32 %v2978_v26, %v956_v36  ;;  %v3595_v22 = vld [vmem:[#allocation16_spill] sm:$0xff]  ;;  %v1681_v26 = vld [vmem:[#allocation4 + $0x68] sm:$0xff]  ;;  %v959_v36 = vadd.f32 %v2918_v40, %v894_v45  ;;  %v1678_v40 = vld [vmem:[#allocation4 + $0x50] sm:$0xff]  ;;  %v897_v45 = vadd.f32 %v2890_v29, %v2861_v54 }
 0x1d4   : > { %1291 = vmatmul.f32.gmra.mxu2 %v3592_v41  ;;  %v3606_v29 = vld [vmem:[#allocation22_spill] sm:$0xff] }
 0x1d5   : > { %v1082_v7 = vpop.f32.mrf.mxu3 }
 0x1d6   : > { %v3036_v11 = vadd.f32 %v1082_v7, %v1018_v25  ;;  %v3596_v25 = vld [vmem:[#allocation15_spill] sm:$0xff]  ;;  %v3597_v7 = vld [vmem:[#allocation17_spill] sm:$0xff] }
 0x1d7   : > { %v3040_v13 = vpop.f32.mrf.mxu2 }
 0x1d8   : > { %3593 = vst [vmem:[#allocation38_spill] sm:$0xff] %v3036_v11  ;;  %v3042_v56 = vpop.f32.mrf.mxu1  ;;  %v1683_v11 = vld [vmem:[#allocation4 + $0x78] sm:$0xff] }
 0x1d9   : > { %1717 = vmatpush.msra.mxu0 %v1683_v11  ;;  %v3600_v11 = vld [vmem:[#allocation18_spill] sm:$0xff] }
 0x1da   : > { %1344 = vmatmul.f32.gmra.mxu3 %v3594_v62 }
 0x1db   : > { %1400 = vmatmul.f32.gmra.mxu0 %v3595_v22  ;;  %1453 = vmatmul.f32.gmra.mxu1 %v3596_v25  ;;  %v3599_v22 = vld [vmem:[#allocation45_spill] sm:$0xff]  ;;  %v1680_v25 = vld [vmem:[#allocation4 + $0x60] sm:$0xff] }
 0x1dc   : > { %1506 = vmatmul.f32.vlgmr.msrb.gmra.mxu2 %v3597_v7  ;;  %1718 = vmatpush.msra.mxu0 %v1682_v0  ;;  %v3065_v7 = vpop.f32.mrf.mxu0  ;;  %v1679_v0 = vld [vmem:[#allocation4 + $0x58] sm:$0xff] }
 0x1dd   : > { %v1085_v14 = vpop.f32.mrf.mxu3 }
 0x1de   : > { %v3052_v41 = vadd.f32 %v1085_v14, %v1021_v39  ;;  %1719 = vmatpush.msra.mxu0 %v1681_v26  ;;  %v1024_v39 = vadd.f32 %v2994_v27, %v959_v36  ;;  %v962_v36 = vadd.f32 %v2934_v21, %v897_v45  ;;  %v1674_v45 = vld [vmem:[#allocation4 + $0x30] sm:$0xff] }
 0x1df   : > { %v3056_v62 = vpop.f32.mrf.mxu2 }
 0x1e0   : > { %3598 = vst [vmem:[#allocation10_spill] sm:$0xff] %v3052_v41  ;;  %v3058_v9 = vpop.f32.mrf.mxu1  ;;  %1720 = vmatpush.msra.mxu0 %v1680_v25  ;;  %v1676_v25 = vld [vmem:[#allocation4 + $0x40] sm:$0xff] }
 0x1e2   : > { %1347 = vmatmul.f32.gmra.mxu3 %v3599_v22  ;;  %1721 = vmatpush.msra.mxu0 %v1679_v0  ;;  %v3605_v0 = vld [vmem:[#allocation20_spill] sm:$0xff] }
 0x1e3   : > { %1403 = vmatmul.f32.gmra.mxu0 %v2566_v43  ;;  %1456 = vmatmul.f32.gmra.mxu1 %v3600_v11  ;;  %v1677_v43 = vld [vmem:[#allocation4 + $0x48] sm:$0xff]  ;;  %v3603_v11 = vld [vmem:[#allocation46_spill] sm:$0xff] }
 0x1e4   : > { %1509 = vmatmul.f32.gmra.mxu2 %v3601_v47  ;;  %1722 = vmatpush.msra.mxu0 %v1678_v40  ;;  %v1715_v47 = vld [vmem:[#allocation4 + $0x178] sm:$0xff]  ;;  %v3084_v21 = vpop.f32.mrf.mxu0 }
 0x1e5   : > { %v1088_v14 = vpop.f32.mrf.mxu3  ;;  %1847 = vmatpush.msra.mxu2 %v1715_v47  ;;  %v1675_v40 = vld [vmem:[#allocation4 + $0x38] sm:$0xff] }
 0x1e6   : > { %v3068_v41 = vadd.f32 %v1088_v14, %v1024_v39  ;;  %1723 = vmatpush.msra.mxu0 %v1677_v43  ;;  %v1027_v39 = vadd.f32 %v3010_v6, %v962_v36  ;;  %v3604_v14 = vld [vmem:[#allocation21_spill] sm:$0xff]  ;;  %v900_v43 = vadd.f32 %v2909_v4, %v2861_v54  ;;  %v1699_v6 = vld [vmem:[#allocation4 + $0xf8] sm:$0xff] }
 0x1e7   : > { %v3072_v26 = vpop.f32.mrf.mxu2  ;;  %1782 = vmatpush.msra.mxu1 %v1699_v6  ;;  %v3610_v4 = vld [vmem:[#allocation23_spill] sm:$0xff] }
 0x1e8   : > { %3602 = vst [vmem:[#allocation11_spill] sm:$0xff] %v3068_v41  ;;  %v3074_v27 = vpop.f32.mrf.mxu1  ;;  %1724 = vmatpush.msra.mxu0 %v1676_v25  ;;  %v965_v25 = vadd.f32 %v2950_v24, %v900_v43  ;;  %v1670_v24 = vld [vmem:[#allocation4 + $0x10] sm:$0xff]  ;;  %v903_v43 = vadd.f32 %v2928_v60, %v2861_v54 }
 0x1e9   : > { %v3612_v60 = vld [vmem:[#allocation26_spill] sm:$0xff] }
 0x1ea   : > { %1350 = vmatmul.f32.gmra.mxu3 %v3603_v11  ;;  %1725 = vmatpush.msra.mxu0 %v1675_v40  ;;  %v3609_v40 = vld [vmem:[#allocation24_spill] sm:$0xff] }
 0x1eb   : > { %1406 = vmatmul.f32.gmra.mxu0 %v3604_v14  ;;  %1459 = vmatmul.f32.gmra.mxu1 %v3605_v0  ;;  %v1673_v14 = vld [vmem:[#allocation4 + $0x28] sm:$0xff]  ;;  %v3608_v0 = vld [vmem:[#allocation47_spill] sm:$0xff] }
 0x1ec   : > { %1512 = vmatmul.f32.gmra.mxu2 %v3606_v29  ;;  %1726 = vmatpush.msra.mxu0 %v1674_v45  ;;  %v1030_v29 = vadd.f32 %v3024_v33, %v965_v25  ;;  %v1671_v45 = vld [vmem:[#allocation4 + $0x18] sm:$0xff]  ;;  %v3104_v33 = vpop.f32.mrf.mxu0  ;;  %v1669_v25 = vld [vmem:[#allocation4 + $0x8] sm:$0xff] }
 0x1ed   : > { %v1091_v41 = vpop.f32.mrf.mxu3 }
 0x1ee   : > { %v3082_v22 = vadd.f32 %v1091_v41, %v1027_v39  ;;  %v1714_v41 = vld [vmem:[#allocation4 + $0x170] sm:$0xff]  ;;  %v1672_v39 = vld [vmem:[#allocation4 + $0x20] sm:$0xff]  ;;  %1727 = vmatpush.msra.mxu0 %v1673_v14 }
 0x1ef   : > { %v3088_v47 = vpop.f32.mrf.mxu2  ;;  %1848 = vmatpush.msra.mxu2 %v1714_v41  ;;  %v1698_v41 = vld [vmem:[#allocation4 + $0xf0] sm:$0xff] }
 0x1f0   : > { %3607 = vst [vmem:[#allocation39_spill] sm:$0xff] %v3082_v22  ;;  %v3090_v36 = vpop.f32.mrf.mxu1  ;;  %v3611_v22 = vld [vmem:[#allocation25_spill] sm:$0xff]  ;;  %1728 = vmatpush.msra.mxu0 %v1672_v39  ;;  %1783 = vmatpush.msra.mxu1 %v1698_v41  ;;  %v1696_v41 = vld [vmem:[#allocation4 + $0xe0] sm:$0xff] }
 0x1f1   : > { %v1713_v39 = vld [vmem:[#allocation4 + $0x168] sm:$0xff] }
 0x1f2   : > { %1353 = vmatmul.f32.gmra.mxu3 %v3608_v0  ;;  %1729 = vmatpush.msra.mxu0 %v1671_v45 }
 0x1f3   : > { %1409 = vmatmul.f32.gmra.mxu0 %v3609_v40  ;;  %1462 = vmatmul.f32.gmra.mxu1 %v3610_v4  ;;  %v3613_v40 = vld [vmem:[#allocation27_spill] sm:$0xff] }
 0x1f4   : > { %1515 = vmatmul.f32.gmra.mxu2 %v3611_v22  ;;  %1730 = vmatpush.msra.mxu0 %v1670_v24  ;;  %v968_v22 = vadd.f32 %v2964_v42, %v903_v43  ;;  %v1697_v24 = vld [vmem:[#allocation4 + $0xe8] sm:$0xff]  ;;  %v1712_v43 = vld [vmem:[#allocation4 + $0x160] sm:$0xff] }
 0x1f5   : > { %v1094_v11 = vpop.f32.mrf.mxu3  ;;  %1849 = vmatpush.msra.mxu2 %v1713_v39  ;;  %1784 = vmatpush.msra.mxu1 %v1697_v24  ;;  %v3616_v39 = vld [vmem:[#allocation29_spill] sm:$0xff]  ;;  %v1692_v24 = vld [vmem:[#allocation4 + $0xc0] sm:$0xff] }
 0x1f6   : > { %v3098_v6 = vadd.f32 %v1094_v11, %v1030_v29  ;;  %v1668_v11 = vld [vmem:[#allocation4] sm:$0xff]  ;;  %1731 = vmatpush.msra.mxu0 %v1669_v25  ;;  %v1033_v54 = vadd.f32 %v3040_v13, %v968_v22  ;;  %v3119_v25 = vpop.f32.mrf.mxu0 }
 0x1f7   : > { %v3102_v14 = vpop.f32.mrf.mxu2  ;;  %1850 = vmatpush.msra.mxu2 %v1712_v43  ;;  %1785 = vmatpush.msra.mxu1 %v1696_v41  ;;  %v3615_v13 = vld [vmem:[#allocation28_spill] sm:$0xff] }
 0x1f8   : > { %v3108_v29 = vpop.f32.mrf.mxu1  ;;  %1732 = vmatpush.msra.mxu0 %v1668_v11 }
 0x1fa   : > { %1356 = vmatmul.f32.gmra.mxu3 %v2851_v19 }
 0x1fb   : > { %1412 = vmatmul.f32.gmra.mxu0 %v2626_v12  ;;  %1465 = vmatmul.f32.gmra.mxu1 %v3612_v60  ;;  %v3614_v12 = vld [vmem:[#allocation30_spill] sm:$0xff] }
 0x1fc   : > { %1518 = vmatmul.f32.gmra.mxu2 %v3613_v40  ;;  %v1694_v60 = vld [vmem:[#allocation4 + $0xd0] sm:$0xff]  ;;  %v1693_v40 = vld [vmem:[#allocation4 + $0xc8] sm:$0xff] }
 0x1fd   : > { %v1097_v4 = vpop.f32.mrf.mxu3 }
 0x1fe   : > { %v3114_v45 = vadd.f32 %v1097_v4, %v1033_v54  ;;  %v1695_v54 = vld [vmem:[#allocation4 + $0xd8] sm:$0xff]  ;;  %v3133_v43 = vpop.f32.mrf.mxu0 }
 0x1ff   : > { %v3116_v42 = vpop.f32.mrf.mxu2  ;;  %1786 = vmatpush.msra.mxu1 %v1695_v54  ;;  %v1711_v4 = vld [vmem:[#allocation4 + $0x158] sm:$0xff]  ;;  %v1689_v54 = vld [vmem:[#allocation4 + $0xa8] sm:$0xff] }
 0x200   : > { %v3123_v22 = vpop.f32.mrf.mxu1  ;;  %1851 = vmatpush.msra.mxu2 %v1711_v4  ;;  %v1686_v4 = vld [vmem:[#allocation4 + $0x90] sm:$0xff] }
 0x201   : > { %1787 = vmatpush.msra.mxu1 %v1694_v60  ;;  %v1687_v60 = vld [vmem:[#allocation4 + $0x98] sm:$0xff] }
 0x202   : > { %1571 = vmatmul.f32.vlgmr.msra.gmra.mxu3 %v2637_v2 }
 0x203   : > { %1415 = vmatmul.f32.gmra.mxu0 %v3614_v12  ;;  %1468 = vmatmul.f32.gmra.mxu1 %v3615_v13  ;;  %v1691_v12 = vld [vmem:[#allocation4 + $0xb8] sm:$0xff] }
 0x204   : > { %1521 = vmatmul.f32.gmra.mxu2 %v3616_v39  ;;  %1788 = vmatpush.msra.mxu1 %v1693_v40 }
 0x205   : > { %v3126_v11 = vpop.f32.mrf.mxu3 }
 0x206   : > { %1789 = vmatpush.msra.mxu1 %v1692_v24  ;;  %v3148_v40 = vpop.f32.mrf.mxu0 }
 0x207   : > { %v3128_v2 = vpop.f32.mrf.mxu2 }
 0x208   : > { %v3138_v13 = vpop.f32.mrf.mxu1  ;;  %1790 = vmatpush.msra.mxu1 %v1691_v12  ;;  %v1685_v12 = vld [vmem:[#allocation4 + $0x88] sm:$0xff] }
 0x20a   : > { %1574 = vmatmul.f32.gmra.mxu3 %v2655_v32  ;;  %v1690_v32 = vld [vmem:[#allocation4 + $0xb0] sm:$0xff] }
 0x20b   : > { %1418 = vmatmul.f32.gmra.mxu0 %v2661_v53  ;;  %1471 = vmatmul.f32.gmra.mxu1 %v2657_v10  ;;  %v1710_v53 = vld [vmem:[#allocation4 + $0x150] sm:$0xff]  ;;  %v1688_v10 = vld [vmem:[#allocation4 + $0xa0] sm:$0xff] }
 0x20c   : > { %1524 = vmatmul.f32.gmra.mxu2 %v2659_v50  ;;  %1791 = vmatpush.msra.mxu1 %v1690_v32 }
 0x20d   : > { %v3136_v41 = vpop.f32.mrf.mxu3  ;;  %1852 = vmatpush.msra.mxu2 %v1710_v53 }
 0x20e   : > { %1792 = vmatpush.msra.mxu1 %v1689_v54  ;;  %v3162_v53 = vpop.f32.mrf.mxu0 }
 0x20f   : > { %v3140_v39 = vpop.f32.mrf.mxu2 }
 0x210   : > { %1793 = vmatpush.msra.mxu1 %v1688_v10  ;;  %v3617_v10 = vld [vmem:[#allocation48_spill] sm:$0xff] }
 0x212   : > { %1577 = vmatmul.f32.gmra.mxu3 %v2672_v52  ;;  %1794 = vmatpush.msra.mxu1 %v1687_v60  ;;  %v3152_v52 = vpop.f32.mrf.mxu1 }
 0x213   : > { %1421 = vmatmul.f32.gmra.mxu0 %v2678_v23  ;;  %1474 = vmatmul.f32.gmra.mxu1 %v2674_v49  ;;  %v1620_v23 = vmax.f32 %v2882_v51, 0.0  ;;  %v1709_v49 = vld [vmem:[#allocation4 + $0x148] sm:$0xff]  ;;  %v1623_v51 = vmax.f32 %v3617_v10, 0.0 }
 0x214   : > { %1527 = vmatmul.f32.gmra.mxu2 %v2676_v35  ;;  %1795 = vmatpush.msra.mxu1 %v1686_v4  ;;  %v1684_v35 = vld [vmem:[#allocation4 + $0x80] sm:$0xff]  ;;  %v1626_v4 = vmax.f32 %v2914_v17, 0.0  ;;  %v3619_v10 = vld [vmem:[#allocation49_spill] sm:$0xff] }
 0x215   : > { %v3146_v50 = vpop.f32.mrf.mxu3  ;;  %1853 = vmatpush.msra.mxu2 %v1709_v49 }
 0x216   : > { %1796 = vmatpush.msra.mxu1 %v1685_v12  ;;  %v1707_v12 = vld [vmem:[#allocation4 + $0x138] sm:$0xff] }
 0x217   : > { %v3150_v24 = vpop.f32.mrf.mxu2 }
 0x218   : > { %1797 = vmatpush.msra.mxu1 %v1684_v35 }
 0x21a   : > { %1580 = vmatmul.f32.gmra.mxu3 %v2687_v30  ;;  %v1708_v30 = vld [vmem:[#allocation4 + $0x140] sm:$0xff]  ;;  %v3166_v60 = vpop.f32.mrf.mxu1 }
 0x21b   : > { %1477 = vmatmul.f32.gmra.mxu1 %v2689_v34  ;;  %1733 = vmatmul.f32.vlgmr.msra.gmra.mxu0 %v1620_v23  ;;  %v3176_v23 = vpop.f32.mrf.mxu0 }
 0x21c   : > { %1530 = vmatmul.f32.gmra.mxu2 %v2691_v3 }
 0x21d   : > { %v3158_v32 = vpop.f32.mrf.mxu3  ;;  %1854 = vmatpush.msra.mxu2 %v1708_v30 }
 0x21f   : > { %v3160_v54 = vpop.f32.mrf.mxu2  ;;  %1855 = vmatpush.msra.mxu2 %v1707_v12  ;;  %v1706_v12 = vld [vmem:[#allocation4 + $0x130] sm:$0xff] }
 0x221   : > { %1856 = vmatpush.msra.mxu2 %v1706_v12  ;;  %v3622_v12 = vld [vmem:[#allocation50_spill] sm:$0xff] }
 0x222   : > { %1583 = vmatmul.f32.gmra.mxu3 %v2702_v38  ;;  %v2126_v38 = vld [vmem:[%s3458_s1 + $0x8] sm:$0xff] }
 0x223   : > { %1480 = vmatmul.f32.gmra.mxu1 %v2704_v16  ;;  %1736 = vmatmul.f32.gmra.mxu0 %v1623_v51  ;;  %v3181_v16 = vperm.slane %v2126_v38, 5  ;;  %v1629_v51 = vmax.f32 %v3619_v10, 0.0 }
 0x224   : > { %1533 = vmatmul.f32.gmra.mxu2 %v2706_v48  ;;  %v3184_v48 = vpop.f32.mrf.mxu1 }
 0x225   : > { %v3170_v34 = vpop.f32.mrf.mxu3 }
 0x227   : > { %v3172_v3 = vpop.f32.mrf.mxu2 }
 0x22a   : > { %1586 = vmatmul.f32.gmra.mxu3 %v3565_v1  ;;  %v3618_v1 = vld [vmem:[#allocation51_spill] sm:$0xff] }
 0x22b   : > { %1483 = vmatmul.f32.gmra.mxu1 %v3566_v18  ;;  %1739 = vmatmul.f32.gmra.mxu0 %v1626_v4  ;;  %v1118_v49 = vadd.f32 %v3618_v1, %v3181_v16  ;;  %v3620_v4 = vld [vmem:[#allocation35_spill] sm:$0xff] }
 0x22c   : > { %1536 = vmatmul.f32.gmra.mxu2 %v2721_v57  ;;  %v3198_v57 = vpop.f32.mrf.mxu0  ;;  %v3204_v10 = vpop.f32.mrf.mxu1 }
 0x22d   : > { %v3187_v17 = vpop.f32.mrf.mxu3  ;;  %v1183_v30 = vadd.f32 %v2980_v8, %v1118_v49  ;;  %v3621_v8 = vld [vmem:[#allocation32_spill] sm:$0xff] }
 0x22f   : > { %v3191_v35 = vpop.f32.mrf.mxu2  ;;  %v1248_v18 = vadd.f32 %v3056_v62, %v1183_v30  ;;  %v1632_v62 = vmax.f32 %v3622_v12, 0.0  ;;  %v1705_v30 = vld [vmem:[#allocation4 + $0x128] sm:$0xff] }
 0x230   : > { %1857 = vmatpush.msra.mxu2 %v1705_v30 }
 0x231   : > { %v1313_v1 = vadd.f32 %v3126_v11, %v1248_v18 }
 0x232   : > { %1589 = vmatmul.f32.gmra.mxu3 %v3568_v15  ;;  %v1121_v15 = vadd.f32 %v3621_v8, %v3181_v16 }
 0x233   : > { %1486 = vmatmul.f32.gmra.mxu1 %v3570_v37  ;;  %1742 = vmatmul.f32.gmra.mxu0 %v1629_v51  ;;  %v1621_v51 = vmax.f32 %v1313_v1, 0.0 }
 0x234   : > { %1539 = vmatmul.f32.gmra.mxu2 %v3620_v4  ;;  %v1186_v37 = vadd.f32 %v2996_v63, %v1121_v15  ;;  %v3218_v8 = vpop.f32.mrf.mxu0  ;;  %v1124_v63 = vadd.f32 %v2987_v55, %v3181_v16  ;;  %v3623_v15 = vld [vmem:[#allocation31_spill] sm:$0xff] }
 0x235   : > { %v3201_v38 = vpop.f32.mrf.mxu3  ;;  %v1635_v12 = vmax.f32 %v3623_v15, 0.0  ;;  %v1703_v15 = vld [vmem:[#allocation4 + $0x118] sm:$0xff] }
 0x236   : > { %v1251_v4 = vadd.f32 %v3072_v26, %v1186_v37  ;;  %v1189_v26 = vadd.f32 %v3012_v5, %v1124_v63 }
 0x237   : > { %v3208_v49 = vpop.f32.mrf.mxu2 }
 0x238   : > { %v1316_v18 = vadd.f32 %v3136_v41, %v1251_v4  ;;  %v1254_v41 = vadd.f32 %v3088_v47, %v1189_v26 }
 0x23a   : > { %1592 = vmatmul.f32.gmra.mxu3 %v3574_v59  ;;  %v3224_v59 = vpop.f32.mrf.mxu1  ;;  %v1319_v37 = vadd.f32 %v3146_v50, %v1254_v41 }
 0x23b   : > { %1745 = vmatmul.f32.gmra.mxu0 %v1632_v62  ;;  %1798 = vmatmul.f32.vlgmr.msra.gmra.mxu1 %v1621_v51  ;;  %v1624_v62 = vmax.f32 %v1316_v18, 0.0  ;;  %v3624_v51 = vld [vmem:[#allocation36_spill] sm:$0xff] }
 0x23c   : > { %1542 = vmatmul.f32.gmra.mxu2 %v3576_v61  ;;  %v1704_v61 = vld [vmem:[#allocation4 + $0x120] sm:$0xff]  ;;  %v1127_v30 = vadd.f32 %v3624_v51, %v3181_v16  ;;  %v3238_v5 = vpop.f32.mrf.mxu0  ;;  %v1627_v47 = vmax.f32 %v1319_v37, 0.0 }
 0x23d   : > { %v3215_v11 = vpop.f32.mrf.mxu3  ;;  %1858 = vmatpush.msra.mxu2 %v1704_v61  ;;  %v3627_v61 = vld [vmem:[#allocation37_spill] sm:$0xff] }
 0x23e   : > { %v1192_v63 = vadd.f32 %v3028_v44, %v1127_v30  ;;  %v1130_v44 = vadd.f32 %v3627_v61, %v3181_v16  ;;  %v3631_v61 = vld [vmem:[#allocation44_spill] sm:$0xff] }
 0x23f   : > { %v3222_v1 = vpop.f32.mrf.mxu2  ;;  %1859 = vmatpush.msra.mxu2 %v1703_v15 }
 0x240   : > { %v1257_v50 = vadd.f32 %v3102_v14, %v1192_v63  ;;  %v1195_v51 = vadd.f32 %v3042_v56, %v1130_v44  ;;  %v1702_v14 = vld [vmem:[#allocation4 + $0x110] sm:$0xff]  ;;  %v3629_v63 = vld [vmem:[#allocation43_spill] sm:$0xff]  ;;  %v1133_v56 = vadd.f32 %v3046_v31, %v3181_v16  ;;  %v1701_v44 = vld [vmem:[#allocation4 + $0x108] sm:$0xff] }
 0x241   : > { %1860 = vmatpush.msra.mxu2 %v1702_v14 }
 0x242   : > { %1595 = vmatmul.f32.gmra.mxu3 %v3578_v58  ;;  %v3625_v58 = vld [vmem:[#allocation33_spill] sm:$0xff] }
 0x243   : > { %1748 = vmatmul.f32.gmra.mxu0 %v1635_v12  ;;  %1801 = vmatmul.f32.gmra.mxu1 %v1624_v62  ;;  %v1638_v18 = vmax.f32 %v3625_v58, 0.0  ;;  %v3626_v12 = vld [vmem:[#allocation41_spill] sm:$0xff]  ;;  %v1322_v62 = vadd.f32 %v3158_v32, %v1257_v50  ;;  %v3630_v50 = vld [vmem:[#allocation8_spill] sm:$0xff] }
 0x244   : > { %1545 = vmatmul.f32.gmra.mxu2 %v3581_v28  ;;  %v3243_v28 = vpop.f32.mrf.mxu1  ;;  %v3257_v58 = vpop.f32.mrf.mxu0 }
 0x245   : > { %v3231_v55 = vpop.f32.mrf.mxu3  ;;  %v1630_v30 = vmax.f32 %v1322_v62, 0.0  ;;  %v1198_v62 = vadd.f32 %v3058_v9, %v1133_v56  ;;  %1861 = vmatpush.msra.mxu2 %v1701_v44  ;;  %v1136_v9 = vadd.f32 %v3065_v7, %v3181_v16  ;;  %v1139_v7 = vadd.f32 %v3084_v21, %v3181_v16 }
 0x246   : > { %v1142_v21 = vadd.f32 %v3104_v33, %v3181_v16 }
 0x247   : > { %v3236_v4 = vpop.f32.mrf.mxu2  ;;  %v1204_v44 = vadd.f32 %v3090_v36, %v1139_v7  ;;  %v3637_v7 = vld [vmem:[#allocation11_spill] sm:$0xff] }
 0x248   : > { %v1207_v36 = vadd.f32 %v3108_v29, %v1142_v21 }
 0x24a   : > { %1598 = vmatmul.f32.gmra.mxu3 %v3584_v46  ;;  %v3628_v46 = vld [vmem:[#allocation34_spill] sm:$0xff] }
 0x24b   : > { %1751 = vmatmul.f32.gmra.mxu0 %v1638_v18  ;;  %1804 = vmatmul.f32.gmra.mxu1 %v1627_v47  ;;  %v1641_v37 = vmax.f32 %v3628_v46, 0.0  ;;  %v1260_v18 = vadd.f32 %v3116_v42, %v1195_v51  ;;  %v1263_v46 = vadd.f32 %v3128_v2, %v1198_v62  ;;  %v1700_v2 = vld [vmem:[#allocation4 + $0x100] sm:$0xff] }
 0x24c   : > { %1548 = vmatmul.f32.gmra.mxu2 %v3626_v12  ;;  %v3260_v32 = vpop.f32.mrf.mxu1  ;;  %v1644_v12 = vmax.f32 %v3630_v50, 0.0 }
 0x24d   : > { %v3247_v26 = vpop.f32.mrf.mxu3  ;;  %v1325_v15 = vadd.f32 %v3170_v34, %v1260_v18  ;;  %v1328_v31 = vadd.f32 %v3187_v17, %v1263_v46  ;;  %v1201_v18 = vadd.f32 %v3074_v27, %v1136_v9  ;;  %1862 = vmatpush.msra.mxu2 %v1700_v2  ;;  %v1272_v2 = vadd.f32 %v3160_v54, %v1207_v36  ;;  %v2127_v54 = vld [vmem:[%s3458_s1 + $0x10] sm:$0xff] }
 0x24f   : > { %v3252_v41 = vpop.f32.mrf.mxu2  ;;  %v1633_v42 = vmax.f32 %v1325_v15, 0.0  ;;  %v3633_v15 = vld [vmem:[#allocation45_spill] sm:$0xff]  ;;  %v1266_v50 = vadd.f32 %v3140_v39, %v1201_v18  ;;  %v1269_v39 = vadd.f32 %v3150_v24, %v1204_v44  ;;  %v3636_v18 = vld [vmem:[#allocation10_spill] sm:$0xff]  ;;  %v3326_v44 = vperm.slane %v2127_v54, 5 }
 0x252   : > { %1601 = vmatmul.f32.gmra.mxu3 %v3589_v20 }
 0x253   : > { %1754 = vmatmul.f32.gmra.mxu0 %v1641_v37  ;;  %1807 = vmatmul.f32.gmra.mxu1 %v1630_v30  ;;  %v3274_v37 = vpop.f32.mrf.mxu0  ;;  %v3632_v30 = vld [vmem:[#allocation9_spill] sm:$0xff] }
 0x254   : > { %1551 = vmatmul.f32.gmra.mxu2 %v3629_v63  ;;  %v3279_v51 = vpop.f32.mrf.mxu1  ;;  %v1647_v14 = vmax.f32 %v3632_v30, 0.0  ;;  %v1636_v63 = vmax.f32 %v1328_v31, 0.0  ;;  %v3635_v31 = vld [vmem:[#allocation46_spill] sm:$0xff]  ;;  %v1334_v30 = vadd.f32 %v3215_v11, %v1269_v39  ;;  %v1337_v11 = vadd.f32 %v3231_v55, %v1272_v2 }
 0x255   : > { %v3263_v47 = vpop.f32.mrf.mxu3 }
 0x257   : > { %v3268_v20 = vpop.f32.mrf.mxu2 }
 0x25a   : > { %1604 = vmatmul.f32.gmra.mxu3 %v3631_v61 }
 0x25b   : > { %1757 = vmatmul.f32.gmra.mxu0 %v1644_v12  ;;  %1810 = vmatmul.f32.gmra.mxu1 %v1633_v42  ;;  %v1331_v12 = vadd.f32 %v3201_v38, %v1266_v50  ;;  %v3290_v62 = vpop.f32.mrf.mxu0  ;;  %v3634_v42 = vld [vmem:[#allocation38_spill] sm:$0xff] }
 0x25c   : > { %v3294_v27 = vpop.f32.mrf.mxu1  ;;  %v1650_v61 = vmax.f32 %v3634_v42, 0.0  ;;  %v1656_v42 = vmax.f32 %v3637_v7, 0.0 }
 0x25d   : > { %v3276_v34 = vpop.f32.mrf.mxu3  ;;  %v1639_v46 = vmax.f32 %v1331_v12, 0.0  ;;  %v1145_v12 = vadd.f32 %v3119_v25, %v3181_v16 }
 0x25f   : > { %v1507_v56 = vpop.f32.mrf.mxu2  ;;  %v1210_v29 = vadd.f32 %v3123_v22, %v1145_v12  ;;  %v1151_v12 = vadd.f32 %v3148_v40, %v3181_v16 }
 0x261   : > { %v1275_v55 = vadd.f32 %v3172_v3, %v1210_v29 }
 0x262   : > { %1607 = vmatmul.f32.gmra.mxu3 %v3633_v15  ;;  %v1642_v15 = vmax.f32 %v1334_v30, 0.0  ;;  %v3638_v30 = vld [vmem:[#allocation39_spill] sm:$0xff] }
 0x263   : > { %1760 = vmatmul.f32.gmra.mxu0 %v1647_v14  ;;  %1813 = vmatmul.f32.gmra.mxu1 %v1636_v63  ;;  %v3305_v14 = vpop.f32.mrf.mxu0  ;;  %v1653_v63 = vmax.f32 %v3636_v18, 0.0  ;;  %v1340_v22 = vadd.f32 %v3247_v26, %v1275_v55  ;;  %v1659_v21 = vmax.f32 %v3638_v30, 0.0 }
 0x264   : > { %v3310_v24 = vpop.f32.mrf.mxu1 }
 0x265   : > { %v3287_v17 = vpop.f32.mrf.mxu3 }
 0x267   : > { %v1510_v9 = vpop.f32.mrf.mxu2 }
 0x26a   : > { %1610 = vmatmul.f32.gmra.mxu3 %v3635_v31  ;;  %v1378_v31 = vadd.f32 %v3238_v5, %v3326_v44 }
 0x26b   : > { %1763 = vmatmul.f32.gmra.mxu0 %v1650_v61  ;;  %1816 = vmatmul.f32.gmra.mxu1 %v1639_v46  ;;  %v1645_v61 = vmax.f32 %v1337_v11, 0.0 }
 0x26c   : > { %v3329_v25 = vpop.f32.mrf.mxu1  ;;  %v1443_v3 = vadd.f32 %v3243_v28, %v1378_v31 }
 0x26d   : > { %v3300_v38 = vpop.f32.mrf.mxu3 }
 0x26f   : > { %v1513_v33 = vpop.f32.mrf.mxu2 }
 0x272   : > { %1613 = vmatmul.f32.gmra.mxu3 %v3608_v0  ;;  %v3321_v0 = vpop.f32.mrf.mxu0 }
 0x273   : > { %1766 = vmatmul.f32.gmra.mxu0 %v1653_v63  ;;  %1819 = vmatmul.f32.gmra.mxu1 %v1642_v15  ;;  %v1648_v63 = vmax.f32 %v1340_v22, 0.0  ;;  %v1508_v15 = vadd.f32 %v1507_v56, %v1443_v3  ;;  %v1216_v56 = vadd.f32 %v3152_v52, %v1151_v12  ;;  %v1384_v52 = vadd.f32 %v3274_v37, %v3326_v44 }
 0x274   : > { %v3345_v5 = vpop.f32.mrf.mxu1  ;;  %v1157_v3 = vadd.f32 %v3176_v23, %v3181_v16 }
 0x275   : > { %v3313_v50 = vpop.f32.mrf.mxu3 }
 0x277   : > { %v1516_v39 = vpop.f32.mrf.mxu2 }
 0x27a   : > { %1616 = vmatmul.f32.gmra.mxu3 %v2851_v19  ;;  %v1148_v19 = vadd.f32 %v3133_v43, %v3181_v16  ;;  %v3342_v26 = vpop.f32.mrf.mxu0 }
 0x27b   : > { %1769 = vmatmul.f32.gmra.mxu0 %v1656_v42  ;;  %1822 = vmatmul.f32.gmra.mxu1 %v1645_v61 }
 0x27c   : > { %v1213_v18 = vadd.f32 %v3138_v13, %v1148_v19  ;;  %v1381_v13 = vadd.f32 %v3257_v58, %v3326_v44  ;;  %v3362_v22 = vpop.f32.mrf.mxu1  ;;  %v1449_v19 = vadd.f32 %v3279_v51, %v1384_v52 }
 0x27d   : > { %v3331_v46 = vpop.f32.mrf.mxu3 }
 0x27e   : > { %v1278_v36 = vadd.f32 %v3191_v35, %v1213_v18  ;;  %v1662_v35 = vmax.f32 %v3098_v6, 0.0  ;;  %v1446_v7 = vadd.f32 %v3260_v32, %v1381_v13  ;;  %v1154_v6 = vadd.f32 %v3162_v53, %v3181_v16 }
 0x27f   : > { %v1519_v29 = vpop.f32.mrf.mxu2  ;;  %v1514_v30 = vadd.f32 %v1513_v33, %v1449_v19 }
 0x280   : > { %v1343_v43 = vadd.f32 %v3263_v47, %v1278_v36  ;;  %v1281_v47 = vadd.f32 %v3208_v49, %v1216_v56  ;;  %v1511_v61 = vadd.f32 %v1510_v9, %v1446_v7  ;;  %v1665_v49 = vmax.f32 %v3114_v45, 0.0 }
 0x281   : > { %v1219_v9 = vadd.f32 %v3166_v60, %v1154_v6  ;;  %v1387_v45 = vadd.f32 %v3290_v62, %v3326_v44  ;;  %v1160_v62 = vadd.f32 %v3198_v57, %v3181_v16 }
 0x282   : > { %v1651_v42 = vmax.f32 %v1343_v43, 0.0  ;;  %v1346_v40 = vadd.f32 %v3276_v34, %v1281_v47  ;;  %v3356_v58 = vpop.f32.mrf.mxu0 }
 0x283   : > { %1772 = vmatmul.f32.gmra.mxu0 %v1659_v21  ;;  %1825 = vmatmul.f32.gmra.mxu1 %v1648_v63  ;;  %v1284_v34 = vadd.f32 %v3222_v1, %v1219_v9  ;;  %v1222_v63 = vadd.f32 %v3184_v48, %v1157_v3  ;;  %v1452_v1 = vadd.f32 %v3294_v27, %v1387_v45 }
 0x284   : > { %v1654_v31 = vmax.f32 %v1346_v40, 0.0  ;;  %v1466_v36 = vpop.f32.mrf.mxu1  ;;  %v1390_v48 = vadd.f32 %v3305_v14, %v3326_v44  ;;  %v1225_v27 = vadd.f32 %v3204_v10, %v1160_v62  ;;  %v1163_v14 = vadd.f32 %v3218_v8, %v3181_v16 }
 0x285   : > { %v1572_v2 = vpop.f32.mrf.mxu3  ;;  %v1349_v37 = vadd.f32 %v3287_v17, %v1284_v34  ;;  %v1517_v17 = vadd.f32 %v1516_v39, %v1452_v1  ;;  %v1393_v10 = vadd.f32 %v3321_v0, %v3326_v44  ;;  %v1396_v0 = vadd.f32 %v3342_v26, %v3326_v44 }
 0x286   : > { %v1573_v11 = vadd.f32 %v1572_v2, %v1508_v15  ;;  %v1287_v15 = vadd.f32 %v3236_v4, %v1222_v63  ;;  %v1455_v13 = vadd.f32 %v3310_v24, %v1390_v48  ;;  %v1290_v39 = vadd.f32 %v3252_v41, %v1225_v27 }
 0x287   : > { %v1522_v53 = vpop.f32.mrf.mxu2  ;;  %v1657_v33 = vmax.f32 %v1349_v37, 0.0  ;;  %v1228_v47 = vadd.f32 %v3224_v59, %v1163_v14  ;;  %v1461_v59 = vadd.f32 %v3345_v5, %v1396_v0  ;;  %v1399_v19 = vadd.f32 %v3356_v58, %v3326_v44 }
 0x288   : > { %v1622_v28 = vmax.f32 %v1573_v11, 0.0  ;;  %v1352_v23 = vadd.f32 %v3300_v38, %v1287_v15  ;;  %v1355_v7 = vadd.f32 %v3313_v50, %v1290_v39 }
 0x289   : > { %v1464_v34 = vadd.f32 %v3362_v22, %v1399_v19 }
 0x28a   : > { %1863 = vmatmul.f32.vlgmr.msra.gmra.mxu2 %v1622_v28  ;;  %v3373_v51 = vpop.f32.mrf.mxu0  ;;  %v1660_v28 = vmax.f32 %v1352_v23, 0.0  ;;  %v1663_v41 = vmax.f32 %v1355_v7, 0.0 }
 0x28b   : > { %1775 = vmatmul.f32.gmra.mxu0 %v1662_v35  ;;  %1828 = vmatmul.f32.gmra.mxu1 %v1651_v42  ;;  %v1520_v35 = vadd.f32 %v1519_v29, %v1455_v13  ;;  %v1293_v29 = vadd.f32 %v3268_v20, %v1228_v47 }
 0x28c   : > { %v1469_v38 = vpop.f32.mrf.mxu1 }
 0x28d   : > { %v1575_v54 = vpop.f32.mrf.mxu3 }
 0x28e   : > { %v1576_v55 = vadd.f32 %v1575_v54, %v1511_v61  ;;  %v1458_v61 = vadd.f32 %v3329_v25, %v1393_v10 }
 0x28f   : > { %v1525_v11 = vpop.f32.mrf.mxu2 }
 0x290   : > { %v1625_v32 = vmax.f32 %v1576_v55, 0.0  ;;  %v1523_v54 = vadd.f32 %v1522_v53, %v1458_v61  ;;  %v1358_v55 = vadd.f32 %v3331_v46, %v1293_v29 }
 0x292   : > { %1866 = vmatmul.f32.gmra.mxu2 %v1625_v32  ;;  %v1404_v4 = vpop.f32.mrf.mxu0  ;;  %v1666_v52 = vmax.f32 %v1358_v55, 0.0  ;;  %v1526_v32 = vadd.f32 %v1525_v11, %v1461_v59 }
 0x293   : > { %1778 = vmatmul.f32.gmra.mxu0 %v1665_v49  ;;  %1831 = vmatmul.f32.gmra.mxu1 %v1654_v31 }
 0x294   : > { %v1472_v8 = vpop.f32.mrf.mxu1 }
 0x295   : > { %v1578_v21 = vpop.f32.mrf.mxu3 }
 0x296   : > { %v1579_v18 = vadd.f32 %v1578_v21, %v1514_v30  ;;  %v1402_v21 = vadd.f32 %v3373_v51, %v3326_v44 }
 0x297   : > { %v1528_v24 = vpop.f32.mrf.mxu2 }
 0x298   : > { %v1628_v60 = vmax.f32 %v1579_v18, 0.0  ;;  %v1529_v26 = vadd.f32 %v1528_v24, %v1464_v34  ;;  %v1467_v3 = vadd.f32 %v1466_v36, %v1402_v21 }
 0x29a   : > { %1869 = vmatmul.f32.gmra.mxu2 %v1628_v60  ;;  %v1407_v50 = vpop.f32.mrf.mxu0 }
 0x29b   : > { %1834 = vmatmul.f32.gmra.mxu1 %v1657_v33  ;;  %v1405_v33 = vadd.f32 %v1404_v4, %v3326_v44  ;;  %v1408_v51 = vadd.f32 %v1407_v50, %v3326_v44 }
 0x29c   : > { %v1475_v31 = vpop.f32.mrf.mxu1 }
 0x29d   : > { %v1581_v2 = vpop.f32.mrf.mxu3  ;;  %v1470_v15 = vadd.f32 %v1469_v38, %v1405_v33  ;;  %v1473_v48 = vadd.f32 %v1472_v8, %v1408_v51 }
 0x29e   : > { %v1582_v43 = vadd.f32 %v1581_v2, %v1517_v17 }
 0x29f   : > { %v1531_v25 = vpop.f32.mrf.mxu2 }
 0x2a0   : > { %v1631_v12 = vmax.f32 %v1582_v43, 0.0  ;;  %v1532_v60 = vadd.f32 %v1531_v25, %v1467_v3 }
 0x2a2   : > { %1872 = vmatmul.f32.gmra.mxu2 %v1631_v12  ;;  %v1410_v9 = vpop.f32.mrf.mxu0 }
 0x2a3   : > { %1837 = vmatmul.f32.gmra.mxu1 %v1660_v28  ;;  %v1411_v4 = vadd.f32 %v1410_v9, %v3326_v44 }
 0x2a4   : > { %v1478_v45 = vpop.f32.mrf.mxu1 }
 0x2a5   : > { %v1584_v56 = vpop.f32.mrf.mxu3  ;;  %v1476_v38 = vadd.f32 %v1475_v31, %v1411_v4 }
 0x2a6   : > { %v1585_v57 = vadd.f32 %v1584_v56, %v1520_v35 }
 0x2a7   : > { %v1534_v30 = vpop.f32.mrf.mxu2 }
 0x2a8   : > { %v1634_v42 = vmax.f32 %v1585_v57, 0.0  ;;  %v1535_v2 = vadd.f32 %v1534_v30, %v1470_v15 }
 0x2aa   : > { %1875 = vmatmul.f32.gmra.mxu2 %v1634_v42  ;;  %v1413_v18 = vpop.f32.mrf.mxu0 }
 0x2ab   : > { %1840 = vmatmul.f32.gmra.mxu1 %v1663_v41  ;;  %v1414_v42 = vadd.f32 %v1413_v18, %v3326_v44 }
 0x2ac   : > { %v1481_v23 = vpop.f32.mrf.mxu1 }
 0x2ad   : > { %v1587_v40 = vpop.f32.mrf.mxu3  ;;  %v1479_v61 = vadd.f32 %v1478_v45, %v1414_v42 }
 0x2ae   : > { %v1588_v16 = vadd.f32 %v1587_v40, %v1523_v54 }
 0x2af   : > { %v1537_v1 = vpop.f32.mrf.mxu2 }
 0x2b0   : > { %v1637_v6 = vmax.f32 %v1588_v16, 0.0  ;;  %v1538_v12 = vadd.f32 %v1537_v1, %v1473_v48 }
 0x2b2   : > { %1878 = vmatmul.f32.gmra.mxu2 %v1637_v6  ;;  %v1416_v17 = vpop.f32.mrf.mxu0 }
 0x2b3   : > { %1843 = vmatmul.f32.gmra.mxu1 %v1666_v52  ;;  %v1417_v40 = vadd.f32 %v1416_v17, %v3326_v44 }
 0x2b4   : > { %v1484_v39 = vpop.f32.mrf.mxu1 }
 0x2b5   : > { %v1590_v20 = vpop.f32.mrf.mxu3  ;;  %v1482_v8 = vadd.f32 %v1481_v23, %v1417_v40 }
 0x2b6   : > { %v1591_v49 = vadd.f32 %v1590_v20, %v1526_v32 }
 0x2b7   : > { %v1540_v36 = vpop.f32.mrf.mxu2 }
 0x2b8   : > { %v1640_v46 = vmax.f32 %v1591_v49, 0.0  ;;  %v1541_v7 = vadd.f32 %v1540_v36, %v1476_v38 }
 0x2ba   : > { %1881 = vmatmul.f32.gmra.mxu2 %v1640_v46  ;;  %v1419_v27 = vpop.f32.mrf.mxu0 }
 0x2bb   : > { %v1420_v32 = vadd.f32 %v1419_v27, %v3326_v44 }
 0x2bc   : > { %v1487_v47 = vpop.f32.mrf.mxu1 }
 0x2bd   : > { %v1593_v53 = vpop.f32.mrf.mxu3  ;;  %v1485_v49 = vadd.f32 %v1484_v39, %v1420_v32 }
 0x2be   : > { %v1594_v5 = vadd.f32 %v1593_v53, %v1529_v26 }
 0x2bf   : > { %v1543_v56 = vpop.f32.mrf.mxu2 }
 0x2c0   : > { %v1643_v37 = vmax.f32 %v1594_v5, 0.0  ;;  %v1544_v41 = vadd.f32 %v1543_v56, %v1479_v61 }
 0x2c2   : > { %1884 = vmatmul.f32.gmra.mxu2 %v1643_v37  ;;  %v1422_v10 = vpop.f32.mrf.mxu0 }
 0x2c3   : > { %v1423_v26 = vadd.f32 %v1422_v10, %v3326_v44 }
 0x2c4   : > { %v1799_v0 = vpop.f32.mrf.mxu1 }
 0x2c5   : > { %v1596_v63 = vpop.f32.mrf.mxu3  ;;  %v1488_v5 = vadd.f32 %v1487_v47, %v1423_v26 }
 0x2c6   : > { %v1597_v58 = vadd.f32 %v1596_v63, %v1532_v60  ;;  %v2128_v63 = vld [vmem:[%s3458_s1] sm:$0xff] }
 0x2c7   : > { %v1546_v29 = vpop.f32.mrf.mxu2 }
 0x2c8   : > { %v1646_v22 = vmax.f32 %v1597_v58, 0.0  ;;  %v1547_v6 = vadd.f32 %v1546_v29, %v1482_v8  ;;  %v3413_v58 = vperm.slane %v2128_v63, 6 }
 0x2ca   : > { %1887 = vmatmul.f32.gmra.mxu2 %v1646_v22  ;;  %v1734_v16 = vpop.f32.mrf.mxu0 }
 0x2cb   : > { %v1735_v33 = vadd.f32 %v1734_v16, %v3413_v58 }
 0x2cc   : > { %v1802_v46 = vpop.f32.mrf.mxu1 }
 0x2cd   : > { %v1599_v43 = vpop.f32.mrf.mxu3  ;;  %v1800_v22 = vadd.f32 %v1799_v0, %v1735_v33 }
 0x2ce   : > { %v1600_v11 = vadd.f32 %v1599_v43, %v1535_v2 }
 0x2cf   : > { %v1549_v25 = vpop.f32.mrf.mxu2 }
 0x2d0   : > { %v1649_v62 = vmax.f32 %v1600_v11, 0.0  ;;  %v1550_v19 = vadd.f32 %v1549_v25, %v1485_v49 }
 0x2d2   : > { %1890 = vmatmul.f32.gmra.mxu2 %v1649_v62  ;;  %v1737_v9 = vpop.f32.mrf.mxu0 }
 0x2d3   : > { %v1738_v23 = vadd.f32 %v1737_v9, %v3413_v58 }
 0x2d4   : > { %v1805_v45 = vpop.f32.mrf.mxu1 }
 0x2d5   : > { %v1602_v13 = vpop.f32.mrf.mxu3  ;;  %v1803_v11 = vadd.f32 %v1802_v46, %v1738_v23 }
 0x2d6   : > { %v1603_v28 = vadd.f32 %v1602_v13, %v1538_v12 }
 0x2d7   : > { %v1552_v53 = vpop.f32.mrf.mxu2 }
 0x2d8   : > { %v1652_v35 = vmax.f32 %v1603_v28, 0.0  ;;  %v1553_v21 = vadd.f32 %v1552_v53, %v1488_v5 }
 0x2da   : > { %1893 = vmatmul.f32.gmra.mxu2 %v1652_v35  ;;  %v1740_v37 = vpop.f32.mrf.mxu0 }
 0x2db   : > { %v1741_v36 = vadd.f32 %v1740_v37, %v3413_v58 }
 0x2dc   : > { %v1808_v44 = vpop.f32.mrf.mxu1 }
 0x2dd   : > { %v1605_v57 = vpop.f32.mrf.mxu3  ;;  %v1806_v12 = vadd.f32 %v1805_v45, %v1741_v36 }
 0x2de   : > { %v1606_v14 = vadd.f32 %v1605_v57, %v1541_v7 }
 0x2e0   : > { %v1655_v24 = vmax.f32 %v1606_v14, 0.0 }
 0x2e2   : > { %1896 = vmatmul.f32.gmra.mxu2 %v1655_v24  ;;  %v1743_v1 = vpop.f32.mrf.mxu0 }
 0x2e3   : > { %v1744_v39 = vadd.f32 %v1743_v1, %v3413_v58 }
 0x2e4   : > { %v1811_v43 = vpop.f32.mrf.mxu1 }
 0x2e5   : > { %v1608_v54 = vpop.f32.mrf.mxu3  ;;  %v1809_v4 = vadd.f32 %v1808_v44, %v1744_v39 }
 0x2e6   : > { %v1609_v50 = vadd.f32 %v1608_v54, %v1544_v41 }
 0x2e8   : > { %v1658_v55 = vmax.f32 %v1609_v50, 0.0 }
 0x2ea   : > { %1899 = vmatmul.f32.gmra.mxu2 %v1658_v55  ;;  %v1746_v2 = vpop.f32.mrf.mxu0 }
 0x2eb   : > { %v1747_v57 = vadd.f32 %v1746_v2, %v3413_v58 }
 0x2ec   : > { %v1814_v27 = vpop.f32.mrf.mxu1 }
 0x2ed   : > { %v1611_v59 = vpop.f32.mrf.mxu3  ;;  %v1812_v14 = vadd.f32 %v1811_v43, %v1747_v57 }
 0x2ee   : > { %v1612_v52 = vadd.f32 %v1611_v59, %v1547_v6 }
 0x2f0   : > { %v1661_v20 = vmax.f32 %v1612_v52, 0.0 }
 0x2f2   : > { %1902 = vmatmul.f32.gmra.mxu2 %v1661_v20  ;;  %v1749_v48 = vpop.f32.mrf.mxu0 }
 0x2f3   : > { %v1750_v61 = vadd.f32 %v1749_v48, %v3413_v58 }
 0x2f4   : > { %v1817_v7 = vpop.f32.mrf.mxu1 }
 0x2f5   : > { %v1614_v31 = vpop.f32.mrf.mxu3  ;;  %v1815_v41 = vadd.f32 %v1814_v27, %v1750_v61 }
 0x2f6   : > { %v1615_v34 = vadd.f32 %v1614_v31, %v1550_v19 }
 0x2f8   : > { %v1664_v30 = vmax.f32 %v1615_v34, 0.0 }
 0x2fa   : > { %1905 = vmatmul.f32.gmra.mxu2 %v1664_v30  ;;  %v1752_v35 = vpop.f32.mrf.mxu0 }
 0x2fb   : > { %v1753_v40 = vadd.f32 %v1752_v35, %v3413_v58 }
 0x2fc   : > { %v1820_v47 = vpop.f32.mrf.mxu1 }
 0x2fd   : > { %v1617_v18 = vpop.f32.mrf.mxu3  ;;  %v1818_v16 = vadd.f32 %v1817_v7, %v1753_v40 }
 0x2fe   : > { %v1618_v3 = vadd.f32 %v1617_v18, %v1553_v21 }
 0x300   : > { %v1667_v60 = vmax.f32 %v1618_v3, 0.0 }
 0x302   : > { %1908 = vmatmul.f32.gmra.mxu2 %v1667_v60  ;;  %v1755_v24 = vpop.f32.mrf.mxu0 }
 0x303   : > { %v1756_v6 = vadd.f32 %v1755_v24, %v3413_v58 }
 0x304   : > { %v1823_v55 = vpop.f32.mrf.mxu1 }
 0x305   : > { %v1821_v52 = vadd.f32 %v1820_v47, %v1756_v6 }
 0x30a   : > { %v1758_v50 = vpop.f32.mrf.mxu0 }
 0x30b   : > { %v1759_v49 = vadd.f32 %v1758_v50, %v3413_v58 }
 0x30c   : > { %v1826_v25 = vpop.f32.mrf.mxu1 }
 0x30d   : > { %v1864_v15 = vpop.f32.mrf.mxu2  ;;  %v1824_v9 = vadd.f32 %v1823_v55, %v1759_v49 }
 0x30e   : > { %v1865_v17 = vadd.f32 %v1864_v15, %v1800_v22 }
 0x310   : > { %1912 = vst [vmem:[%s3421_s5] sm:$0xff] %v1865_v17 }
 0x312   : > { %v1761_v59 = vpop.f32.mrf.mxu0 }
 0x313   : > { %v1762_v26 = vadd.f32 %v1761_v59, %v3413_v58 }
 0x314   : > { %v1829_v34 = vpop.f32.mrf.mxu1 }
 0x315   : > { %v1867_v51 = vpop.f32.mrf.mxu2  ;;  %v1827_v30 = vadd.f32 %v1826_v25, %v1762_v26 }
 0x316   : > { %v1868_v62 = vadd.f32 %v1867_v51, %v1803_v11 }
 0x318   : > { %1913 = vst [vmem:[%s3421_s5 + $0x8] sm:$0xff] %v1868_v62 }
 0x31a   : > { %v1764_v19 = vpop.f32.mrf.mxu0 }
 0x31b   : > { %v1765_v18 = vadd.f32 %v1764_v19, %v3413_v58 }
 0x31c   : > { %v1832_v37 = vpop.f32.mrf.mxu1 }
 0x31d   : > { %v1870_v13 = vpop.f32.mrf.mxu2  ;;  %v1830_v3 = vadd.f32 %v1829_v34, %v1765_v18 }
 0x31e   : > { %v1871_v28 = vadd.f32 %v1870_v13, %v1806_v12 }
 0x320   : > { %1914 = vst [vmem:[%s3421_s5 + $0x10] sm:$0xff] %v1871_v28 }
 0x322   : > { %v1767_v21 = vpop.f32.mrf.mxu0 }
 0x323   : > { %v1768_v1 = vadd.f32 %v1767_v21, %v3413_v58 }
 0x324   : > { %v1835_v44 = vpop.f32.mrf.mxu1 }
 0x325   : > { %v1873_v38 = vpop.f32.mrf.mxu2  ;;  %v1833_v33 = vadd.f32 %v1832_v37, %v1768_v1 }
 0x326   : > { %v1874_v56 = vadd.f32 %v1873_v38, %v1809_v4 }
 0x328   : > { %1915 = vst [vmem:[%s3421_s5 + $0x18] sm:$0xff] %v1874_v56 }
 0x32a   : > { %v1770_v63 = vpop.f32.mrf.mxu0 }
 0x32b   : > { %v1771_v17 = vadd.f32 %v1770_v63, %v3413_v58 }
 0x32c   : > { %v1838_v43 = vpop.f32.mrf.mxu1 }
 0x32d   : > { %v1876_v10 = vpop.f32.mrf.mxu2  ;;  %v1836_v23 = vadd.f32 %v1835_v44, %v1771_v17 }
 0x32e   : > { %v1877_v42 = vadd.f32 %v1876_v10, %v1812_v14 }
 0x330   : > { %1916 = vst [vmem:[%s3421_s5 + $0x20] sm:$0xff] %v1877_v42 }
 0x332   : > { %v1773_v2 = vpop.f32.mrf.mxu0 }
 0x333   : > { %v1774_v62 = vadd.f32 %v1773_v2, %v3413_v58 }
 0x334   : > { %v1841_v13 = vpop.f32.mrf.mxu1 }
 0x335   : > { %v1879_v29 = vpop.f32.mrf.mxu2  ;;  %v1839_v36 = vadd.f32 %v1838_v43, %v1774_v62 }
 0x336   : > { %v1880_v54 = vadd.f32 %v1879_v29, %v1815_v41 }
 0x338   : > { %1917 = vst [vmem:[%s3421_s5 + $0x28] sm:$0xff] %v1880_v54 }
 0x33a   : > { %v1776_v48 = vpop.f32.mrf.mxu0 }
 0x33b   : > { %v1777_v28 = vadd.f32 %v1776_v48, %v3413_v58 }
 0x33c   : > { %v1844_v56 = vpop.f32.mrf.mxu1 }
 0x33d   : > { %v1882_v8 = vpop.f32.mrf.mxu2  ;;  %v1842_v39 = vadd.f32 %v1841_v13, %v1777_v28 }
 0x33e   : > { %v1883_v0 = vadd.f32 %v1882_v8, %v1818_v16 }
 0x340   : > { %1918 = vst [vmem:[%s3421_s5 + $0x30] sm:$0xff] %v1883_v0 }
 0x342   : > { %v1779_v38 = vpop.f32.mrf.mxu0 }
 0x343   : > { %v1780_v7 = vadd.f32 %v1779_v38, %v3413_v58 }
 0x345   : > { %v1885_v32 = vpop.f32.mrf.mxu2  ;;  %v1845_v57 = vadd.f32 %v1844_v56, %v1780_v7 }
 0x346   : > { %v1886_v20 = vadd.f32 %v1885_v32, %v1821_v52 }
 0x348   : > { %1919 = vst [vmem:[%s3421_s5 + $0x38] sm:$0xff] %v1886_v20 }
 0x34d   : > { %v1888_v46 = vpop.f32.mrf.mxu2 }
 0x34e   : > { %v1889_v31 = vadd.f32 %v1888_v46, %v1824_v9 }
 0x350   : > { %1920 = vst [vmem:[%s3421_s5 + $0x40] sm:$0xff] %v1889_v31 }
 0x355   : > { %v1891_v53 = vpop.f32.mrf.mxu2 }
 0x356   : > { %v1892_v5 = vadd.f32 %v1891_v53, %v1827_v30 }
 0x358   : > { %1921 = vst [vmem:[%s3421_s5 + $0x48] sm:$0xff] %v1892_v5 }
 0x35d   : > { %v1894_v45 = vpop.f32.mrf.mxu2 }
 0x35e   : > { %v1895_v60 = vadd.f32 %v1894_v45, %v1830_v3 }
 0x360   : > { %1922 = vst [vmem:[%s3421_s5 + $0x50] sm:$0xff] %v1895_v60 }
 0x365   : > { %v1897_v22 = vpop.f32.mrf.mxu2 }
 0x366   : > { %v1898_v15 = vadd.f32 %v1897_v22, %v1833_v33 }
 0x368   : > { %1923 = vst [vmem:[%s3421_s5 + $0x58] sm:$0xff] %v1898_v15 }
 0x36d   : > { %v1900_v11 = vpop.f32.mrf.mxu2 }
 0x36e   : > { %v1901_v51 = vadd.f32 %v1900_v11, %v1836_v23 }
 0x370   : > { %1924 = vst [vmem:[%s3421_s5 + $0x60] sm:$0xff] %v1901_v51 }
 0x375   : > { %v1903_v12 = vpop.f32.mrf.mxu2 }
 0x376   : > { %v1904_v27 = vadd.f32 %v1903_v12, %v1839_v36 }
 0x378   : > { %1925 = vst [vmem:[%s3421_s5 + $0x68] sm:$0xff] %v1904_v27 }
 0x37d   : > { %v1906_v4 = vpop.f32.mrf.mxu2 }
 0x37e   : > { %v1907_v35 = vadd.f32 %v1906_v4, %v1842_v39 }
 0x380   : > { %1926 = vst [vmem:[%s3421_s5 + $0x70] sm:$0xff] %v1907_v35 }
 0x385   : > { %v1909_v14 = vpop.f32.mrf.mxu2 }
 0x386   : > { %v1910_v10 = vadd.f32 %v1909_v14, %v1845_v57 }
 0x388   : > { %1927 = vst [vmem:[%s3421_s5 + $0x78] sm:$0xff] %v1910_v10 }
 0x389 PF: > { %s16_s15 = sadd.s32 1, %s2203_s15  }
 0x38a   : > { %p13_p7 = scmp.ge.s32.totalorder %s16_s15, 4  }
 0x38c   :  { %15 = sbr.rel (!%p13_p7) target bundleno = 2 (0x2), region = 75 }
 0x391   :  { %1950 = vsyncpa [#allocation3], 1 }
 0x392   :  { %1952 = vsyncpa [#allocation3 + $0x1], 1 }
 0x393   :  { %1953 = vsyncpa [#allocation5], 1 }

</bundles_post_ra>
